<compile_context>
chip_gen: v6e
topology: v6e:2x2x1
jax: 0.10.0
libtpu: 0.0.40
codegen_flags: <defaults>
</compile_context>

<pallas_src>
import functools

import jax
import jax.numpy as jnp
from jax.experimental import pallas as pl
from jax.experimental.pallas import tpu as pltpu


# Fits the scoped-VMEM default on v6e/v7x (32 MiB) and safely raises v5e's
# 16 MiB default; the tile choices below use only a few MiB of it.
_VMEM_LIMIT_BYTES = 32 * 1024 * 1024


def _round_up(x, m):
    return (x + m - 1) // m * m


def _pick_tile(dim, candidates):
    for c in candidates:
        if dim % c == 0:
            return c
    return dim


def _pad2(a, rows, cols):
    return jnp.pad(a, ((0, rows - a.shape[0]), (0, cols - a.shape[1])))


# ----------------------------------------------------------------------------
# Kernel 1: tiled matmul + bias (+ optional ReLU) — the two Linear layers.
#   y = relu?(x @ w + b)
# ----------------------------------------------------------------------------
def _linear_bias_act_kernel(relu, x_ref, w_ref, bias_ref, o_ref, acc_ref):
    k = pl.program_id(2)

    @pl.when(k == 0)
    def _init():
        acc_ref[...] = jnp.zeros_like(acc_ref)

    acc_ref[...] += jnp.dot(x_ref[...], w_ref[...],
                            preferred_element_type=jnp.float32)

    @pl.when(k == pl.num_programs(2) - 1)
    def _finalize():
        y = acc_ref[...] + bias_ref[...]
        if relu:
            y = jnp.maximum(y, 0.0)
        o_ref[...] = y.astype(o_ref.dtype)


def linear_bias_act(x, w, bias, relu, out_dtype):
    """relu?(x @ w + b); bias broadcast over rows. Lane-dense padded output."""
    M, K = x.shape
    K2, N = w.shape
    assert K == K2
    Mp = _round_up(max(M, 8), 8)
    Kp = _round_up(K, 128)
    Np = _round_up(N, 128)
    tm = _pick_tile(Mp, (256, 128, 64, 32, 16, 8))
    tk = _pick_tile(Kp, (512, 256, 128))
    tn = _pick_tile(Np, (512, 256, 128))

    xp = _pad2(x.astype(jnp.bfloat16), Mp, Kp)
    wp = _pad2(w.astype(jnp.bfloat16), Kp, Np)
    bp = _pad2(bias.reshape(1, N).astype(jnp.float32), 1, Np)

    out = pl.pallas_call(
        functools.partial(_linear_bias_act_kernel, relu),
        out_shape=jax.ShapeDtypeStruct((Mp, Np), out_dtype),
        grid=(Mp // tm, Np // tn, Kp // tk),
        in_specs=[
            pl.BlockSpec((tm, tk), lambda i, j, k: (i, k)),
            pl.BlockSpec((tk, tn), lambda i, j, k: (k, j)),
            pl.BlockSpec((1, tn), lambda i, j, k: (0, j)),
        ],
        out_specs=pl.BlockSpec((tm, tn), lambda i, j, k: (i, j)),
        scratch_shapes=[pltpu.VMEM((tm, tn), jnp.float32)],
        compiler_params=pltpu.CompilerParams(
            dimension_semantics=("parallel", "parallel", "arbitrary"),
            vmem_limit_bytes=_VMEM_LIMIT_BYTES,
        ),
    )(xp, wp, bp)
    return out[:M, :N]


# ----------------------------------------------------------------------------
# Kernel 2: conv-as-GEMM + BatchNorm + ReLU + fused 2x2 MaxPool.
#   Input patches are arranged pool-phase-major: (4, B*Ho*Wo, kh*kw*Cin).
#   The kernel keeps a (4, tm, tn) f32 accumulator (one slab per pool phase,
#   4 back-to-back MXU matmuls per K step sharing the same RHS), then in the
#   epilogue applies BN + ReLU per phase with a running max (ReLU commutes
#   with the pool max, BN does not since its scale can be negative).
# ----------------------------------------------------------------------------
def _conv_gemm_bn_relu_pool_kernel(x_ref, w_ref, scale_ref, shift_ref, o_ref,
                                   acc_ref):
    k = pl.program_id(2)

    @pl.when(k == 0)
    def _init():
        acc_ref[...] = jnp.zeros_like(acc_ref)

    w = w_ref[...]
    for p in range(4):  # static unroll: 4 MXU matmuls per K step, same RHS
        acc_ref[p] += jnp.dot(x_ref[p], w, preferred_element_type=jnp.float32)

    @pl.when(k == pl.num_programs(2) - 1)
    def _finalize():
        sc = scale_ref[...]                       # (1, tn)
        sh = shift_ref[...]                       # (1, tn)
        pooled = jnp.maximum(acc_ref[0] * sc + sh, 0.0)
        for p in range(1, 4):                     # running 2x2 max pool
            pooled = jnp.maximum(pooled,
                                 jnp.maximum(acc_ref[p] * sc + sh, 0.0))
        o_ref[...] = pooled.astype(o_ref.dtype)


def conv_gemm_bn_relu_pool(patches4, w, scale, shift, out_dtype):
    """patches4: (4, M, K) phase-major im2col; returns pooled (M, N)."""
    _, M, K = patches4.shape
    K2, N = w.shape
    assert K == K2
    Mp = _round_up(max(M, 8), 8)
    Kp = _round_up(K, 128)
    Np = _round_up(N, 128)
    tm = _pick_tile(Mp, (256, 128, 64, 32, 16, 8))
    tk = _pick_tile(Kp, (512, 256, 128))
    tn = _pick_tile(Np, (256, 128))

    pp = jnp.pad(patches4.astype(jnp.bfloat16),
                 ((0, 0), (0, Mp - M), (0, Kp - K)))
    wp = _pad2(w.astype(jnp.bfloat16), Kp, Np)
    scp = _pad2(scale.reshape(1, N).astype(jnp.float32), 1, Np)
    shp = _pad2(shift.reshape(1, N).astype(jnp.float32), 1, Np)

    out = pl.pallas_call(
        _conv_gemm_bn_relu_pool_kernel,
        out_shape=jax.ShapeDtypeStruct((Mp, Np), out_dtype),
        grid=(Mp // tm, Np // tn, Kp // tk),
        in_specs=[
            pl.BlockSpec((4, tm, tk), lambda i, j, k: (0, i, k)),
            pl.BlockSpec((tk, tn), lambda i, j, k: (k, j)),
            pl.BlockSpec((1, tn), lambda i, j, k: (0, j)),
            pl.BlockSpec((1, tn), lambda i, j, k: (0, j)),
        ],
        out_specs=pl.BlockSpec((tm, tn), lambda i, j, k: (i, j)),
        scratch_shapes=[pltpu.VMEM((4, tm, tn), jnp.float32)],
        compiler_params=pltpu.CompilerParams(
            dimension_semantics=("parallel", "parallel", "arbitrary"),
            vmem_limit_bytes=_VMEM_LIMIT_BYTES,
        ),
    )(pp, wp, scp, shp)
    return out[:M, :N]


# ----------------------------------------------------------------------------
# Conv layer wrapper: im2col (glue) arranged by 2x2-pool phase + fused kernel.
# ----------------------------------------------------------------------------
def _im2col_pool_phases(x, kh, kw, pad):
    """NHWC -> (4, B*Ho*Wo, kh*kw*C), 'same' padding, stride 1, phase-major."""
    B, H, W, C = x.shape
    Ho, Wo = H // 2, W // 2
    xp = jnp.pad(x, ((0, 0), (pad, pad), (pad, pad), (0, 0)))
    cols = []
    for dy in range(kh):
        for dx in range(kw):
            cols.append(xp[:, dy:dy + H, dx:dx + W, :])
    pat = jnp.stack(cols, axis=3).reshape(B, H, W, kh * kw * C)
    # split spatial dims into (pooled coord, 2x2 phase), make phase major
    pat = pat.reshape(B, Ho, 2, Wo, 2, kh * kw * C)
    pat = pat.transpose(2, 4, 0, 1, 3, 5)            # (py, px, B, Ho, Wo, K)
    return pat.reshape(4, B * Ho * Wo, kh * kw * C)


def conv_bn_relu_pool(x, w_hwio, conv_b, gamma, beta, mean, var, eps=1e-5):
    """Conv2d(stride=1, pad=k//2) + BatchNorm2d(eval) + ReLU + MaxPool2d(2,2)."""
    B, H, W, Cin = x.shape
    kh, kw, _, Cout = w_hwio.shape
    assert H % 2 == 0 and W % 2 == 0 and kh % 2 == 1  # 'same' pad + even pool
    pad = kh // 2
    Ho, Wo = H // 2, W // 2
    # TODO(synk): im2col patches are still materialized by XLA before the
    # pallas_call (in bf16 now); an in-kernel tap-accumulation variant would
    # cut that HBM traffic further for large feature maps.
    patches4 = _im2col_pool_phases(x, kh, kw, pad)    # (4, B*Ho*Wo, kh*kw*Cin)
    wmat = w_hwio.reshape(kh * kw * Cin, Cout)
    bn_scale = (gamma / jnp.sqrt(var + eps)).astype(jnp.float32)
    shift = ((conv_b - mean) * bn_scale + beta).astype(jnp.float32)
    y = conv_gemm_bn_relu_pool(patches4, wmat, bn_scale, shift,
                               out_dtype=jnp.bfloat16)
    return y.reshape(B, Ho, Wo, Cout)


# ----------------------------------------------------------------------------
# Parameters (deterministic synthetic init, shapes match the PyTorch module)
# ----------------------------------------------------------------------------
def init_params(key, num_layers, base_channel_sz, feature_size, num_classes):
    params = {"convs": []}
    k = key

    def nxt():
        nonlocal k
        k, sub = jax.random.split(k)
        return sub

    def conv_block(cin, cout, ksz):
        return dict(
            w=jax.random.normal(nxt(), (ksz, ksz, cin, cout), jnp.float32) * 0.05,
            b=jax.random.normal(nxt(), (cout,), jnp.float32) * 0.05,
            gamma=jnp.ones((cout,), jnp.float32),
            beta=jnp.zeros((cout,), jnp.float32),
            mean=jnp.zeros((cout,), jnp.float32),
            var=jnp.ones((cout,), jnp.float32),
        )

    # self.beginning: Conv2d(3 -> base, k=7, pad=3) + BN + ReLU + MaxPool
    params["convs"].append(conv_block(3, base_channel_sz, 7))
    fs = feature_size // 2
    # self.convolutional: num_layers x [Conv2d + BN + ReLU + MaxPool]
    for i in range(num_layers):
        params["convs"].append(
            conv_block(base_channel_sz * (i + 1), base_channel_sz * (i + 2), 3))
        fs //= 2

    c_final = base_channel_sz * (num_layers + 1)
    fc_in = c_final * fs * fs
    # fc1 weight is defined in PyTorch's NCHW-flatten row order (c, h, w) and
    # permuted ONCE here to the kernel's NHWC flatten order (h, w, c) — the
    # activation transpose is folded into the weight, not done per forward.
    fc1_w_nchw = jax.random.normal(nxt(), (fc_in, 512), jnp.float32) * 0.05
    params["fc1_w"] = (fc1_w_nchw.reshape(c_final, fs, fs, 512)
                       .transpose(1, 2, 0, 3).reshape(fc_in, 512))
    params["fc1_b"] = jnp.zeros((512,), jnp.float32)
    params["fc2_w"] = jax.random.normal(nxt(), (512, num_classes), jnp.float32) * 0.05
    params["fc2_b"] = jnp.zeros((num_classes,), jnp.float32)
    return params


# ----------------------------------------------------------------------------
# Forward pass (matches Base_Network.forward in eval mode)
# ----------------------------------------------------------------------------
def base_network_forward(params, x_nchw):
    # PyTorch NCHW input -> internal NHWC; bf16 activation flow through convs.
    x = jnp.transpose(x_nchw, (0, 2, 3, 1)).astype(jnp.bfloat16)

    for blk in params["convs"]:
        x = conv_bn_relu_pool(x, blk["w"], blk["b"], blk["gamma"],
                              blk["beta"], blk["mean"], blk["var"])

    # NHWC flatten; fc1_w rows were permuted at init to match PyTorch's
    # x.view(B, -1) on NCHW.
    B = x.shape[0]
    x = x.reshape(B, -1)

    x = linear_bias_act(x, params["fc1_w"], params["fc1_b"], relu=True,
                        out_dtype=jnp.bfloat16)
    # Dropout(p): identity in eval/inference mode.
    x = linear_bias_act(x, params["fc2_w"], params["fc2_b"], relu=False,
                        out_dtype=jnp.float32)
    return x


# ----------------------------------------------------------------------------
if __name__ == "__main__":
    key = jax.random.PRNGKey(0)
    kx, kp = jax.random.split(key)

    # Small shapes consistent with the module: feature_size=16, base=8,
    # num_layers=2, num_classes=10  ->  FC in_features = 24*2*2 = 96.
    num_layers = 2
    feature_size = 16
    base_channel_sz = 8
    num_classes = 10

    x = jax.random.normal(kx, (2, 3, feature_size, feature_size), jnp.float32)
    params = init_params(kp, num_layers, base_channel_sz, feature_size,
                         num_classes)

    fwd = jax.jit(base_network_forward)
    out = fwd(params, x)
    out = jax.block_until_ready(out)
    assert out.shape == (2, num_classes), out.shape
    assert bool(jnp.all(jnp.isfinite(out)))
    print("KERNEL_OK")
</pallas_src>

<mosaic_0001>
module attributes {stable_mosaic.version = 11 : i64} {
  func.func @_conv_gemm_bn_relu_pool_kernel(%arg0: i32, %arg1: i32, %arg2: i32, %arg3: memref<4x128x256xbf16, #tpu.memory_space<vmem>>, %arg4: memref<256x128xbf16, #tpu.memory_space<vmem>>, %arg5: memref<1x128xf32, #tpu.memory_space<vmem>>, %arg6: memref<1x128xf32, #tpu.memory_space<vmem>>, %arg7: memref<128x128xbf16, #tpu.memory_space<vmem>>, %arg8: memref<4x128x128xf32, #tpu.memory_space<vmem>>) attributes {dimension_semantics = [#tpu.dimension_semantics<parallel>, #tpu.dimension_semantics<parallel>, #tpu.dimension_semantics<arbitrary>], iteration_bounds = array<i64: 1, 1, 1>, scalar_prefetch = 0 : i64, scratch_operands = 1 : i64, tpu.core_type = #tpu.core_type<tc>, window_params = [{transform_indices = @transform_0, window_bounds = array<i64: 4, 128, 256>}, {transform_indices = @transform_1, window_bounds = array<i64: 256, 128>}, {transform_indices = @transform_2, window_bounds = array<i64: 1, 128>}, {transform_indices = @transform_3, window_bounds = array<i64: 1, 128>}, {transform_indices = @transform_4, window_bounds = array<i64: 128, 128>}]} {
    %c0_i32 = arith.constant 0 : i32
    %0 = arith.cmpi eq, %arg2, %c0_i32 : i32
    %1 = arith.extui %0 : i1 to i32
    %c0_i32_0 = arith.constant 0 : i32
    %2 = arith.cmpi ne, %1, %c0_i32_0 : i32
    scf.if %2 {
      %cst_40 = arith.constant 0.000000e+00 : f32
      %43 = vector.broadcast %cst_40 : f32 to vector<4x128x128xf32>
      %c0_41 = arith.constant 0 : index
      %c0_42 = arith.constant 0 : index
      %c0_43 = arith.constant 0 : index
      %44 = vector.load %arg8[%c0_41, %c0_42, %c0_43] : memref<4x128x128xf32, #tpu.memory_space<vmem>>, vector<4x128x128xf32>
      tpu.vector_store %arg8[%c0_41, %c0_42, %c0_43], %43 {strides = array<i32>} : memref<4x128x128xf32, #tpu.memory_space<vmem>>, vector<4x128x128xf32>,
    } else {
    }
    %c0 = arith.constant 0 : index
    %c0_1 = arith.constant 0 : index
    %3 = vector.load %arg4[%c0, %c0_1] : memref<256x128xbf16, #tpu.memory_space<vmem>>, vector<256x128xbf16>
    %c0_2 = arith.constant 0 : index
    %c0_3 = arith.constant 0 : index
    %c0_4 = arith.constant 0 : index
    %4 = vector.load %arg8[%c0_2, %c0_3, %c0_4] : memref<4x128x128xf32, #tpu.memory_space<vmem>>, vector<1x128x128xf32>
    %5 = vector.shape_cast %4 : vector<1x128x128xf32> to vector<128x128xf32>
    %c0_5 = arith.constant 0 : index
    %c0_6 = arith.constant 0 : index
    %c0_7 = arith.constant 0 : index
    %6 = vector.load %arg3[%c0_5, %c0_6, %c0_7] : memref<4x128x256xbf16, #tpu.memory_space<vmem>>, vector<1x128x256xbf16>
    %7 = vector.shape_cast %6 : vector<1x128x256xbf16> to vector<128x256xbf16>
    %cst = arith.constant dense<0.000000e+00> : vector<128x128xf32>
    %8 = tpu.matmul %7, %3, %cst {dimension_numbers = #tpu.dot_dimension_numbers<[1], [0], [0], [1], [0, 0, 1, 1], [], []>} : vector<128x256xbf16>, vector<256x128xbf16>, vector<128x128xf32> -> vector<128x128xf32>
    %9 = arith.addf %5, %8 : vector<128x128xf32>
    %c0_8 = arith.constant 0 : index
    %c0_9 = arith.constant 0 : index
    %c0_10 = arith.constant 0 : index
    %10 = vector.load %arg8[%c0_8, %c0_9, %c0_10] : memref<4x128x128xf32, #tpu.memory_space<vmem>>, vector<1x128x128xf32>
    %11 = vector.shape_cast %10 : vector<1x128x128xf32> to vector<128x128xf32>
    %12 = vector.shape_cast %9 : vector<128x128xf32> to vector<1x128x128xf32>
    tpu.vector_store %arg8[%c0_8, %c0_9, %c0_10], %12 {strides = array<i32>} : memref<4x128x128xf32, #tpu.memory_space<vmem>>, vector<1x128x128xf32>,
    %c1 = arith.constant 1 : index
    %c0_11 = arith.constant 0 : index
    %c0_12 = arith.constant 0 : index
    %13 = vector.load %arg8[%c1, %c0_11, %c0_12] : memref<4x128x128xf32, #tpu.memory_space<vmem>>, vector<1x128x128xf32>
    %14 = vector.shape_cast %13 : vector<1x128x128xf32> to vector<128x128xf32>
    %c1_13 = arith.constant 1 : index
    %c0_14 = arith.constant 0 : index
    %c0_15 = arith.constant 0 : index
    %15 = vector.load %arg3[%c1_13, %c0_14, %c0_15] : memref<4x128x256xbf16, #tpu.memory_space<vmem>>, vector<1x128x256xbf16>
    %16 = vector.shape_cast %15 : vector<1x128x256xbf16> to vector<128x256xbf16>
    %cst_16 = arith.constant dense<0.000000e+00> : vector<128x128xf32>
    %17 = tpu.matmul %16, %3, %cst_16 {dimension_numbers = #tpu.dot_dimension_numbers<[1], [0], [0], [1], [0, 0, 1, 1], [], []>} : vector<128x256xbf16>, vector<256x128xbf16>, vector<128x128xf32> -> vector<128x128xf32>
    %18 = arith.addf %14, %17 : vector<128x128xf32>
    %c1_17 = arith.constant 1 : index
    %c0_18 = arith.constant 0 : index
    %c0_19 = arith.constant 0 : index
    %19 = vector.load %arg8[%c1_17, %c0_18, %c0_19] : memref<4x128x128xf32, #tpu.memory_space<vmem>>, vector<1x128x128xf32>
    %20 = vector.shape_cast %19 : vector<1x128x128xf32> to vector<128x128xf32>
    %21 = vector.shape_cast %18 : vector<128x128xf32> to vector<1x128x128xf32>
    tpu.vector_store %arg8[%c1_17, %c0_18, %c0_19], %21 {strides = array<i32>} : memref<4x128x128xf32, #tpu.memory_space<vmem>>, vector<1x128x128xf32>,
    %c2 = arith.constant 2 : index
    %c0_20 = arith.constant 0 : index
    %c0_21 = arith.constant 0 : index
    %22 = vector.load %arg8[%c2, %c0_20, %c0_21] : memref<4x128x128xf32, #tpu.memory_space<vmem>>, vector<1x128x128xf32>
    %23 = vector.shape_cast %22 : vector<1x128x128xf32> to vector<128x128xf32>
    %c2_22 = arith.constant 2 : index
    %c0_23 = arith.constant 0 : index
    %c0_24 = arith.constant 0 : index
    %24 = vector.load %arg3[%c2_22, %c0_23, %c0_24] : memref<4x128x256xbf16, #tpu.memory_space<vmem>>, vector<1x128x256xbf16>
    %25 = vector.shape_cast %24 : vector<1x128x256xbf16> to vector<128x256xbf16>
    %cst_25 = arith.constant dense<0.000000e+00> : vector<128x128xf32>
    %26 = tpu.matmul %25, %3, %cst_25 {dimension_numbers = #tpu.dot_dimension_numbers<[1], [0], [0], [1], [0, 0, 1, 1], [], []>} : vector<128x256xbf16>, vector<256x128xbf16>, vector<128x128xf32> -> vector<128x128xf32>
    %27 = arith.addf %23, %26 : vector<128x128xf32>
    %c2_26 = arith.constant 2 : index
    %c0_27 = arith.constant 0 : index
    %c0_28 = arith.constant 0 : index
    %28 = vector.load %arg8[%c2_26, %c0_27, %c0_28] : memref<4x128x128xf32, #tpu.memory_space<vmem>>, vector<1x128x128xf32>
    %29 = vector.shape_cast %28 : vector<1x128x128xf32> to vector<128x128xf32>
    %30 = vector.shape_cast %27 : vector<128x128xf32> to vector<1x128x128xf32>
    tpu.vector_store %arg8[%c2_26, %c0_27, %c0_28], %30 {strides = array<i32>} : memref<4x128x128xf32, #tpu.memory_space<vmem>>, vector<1x128x128xf32>,
    %c3 = arith.constant 3 : index
    %c0_29 = arith.constant 0 : index
    %c0_30 = arith.constant 0 : index
    %31 = vector.load %arg8[%c3, %c0_29, %c0_30] : memref<4x128x128xf32, #tpu.memory_space<vmem>>, vector<1x128x128xf32>
    %32 = vector.shape_cast %31 : vector<1x128x128xf32> to vector<128x128xf32>
    %c3_31 = arith.constant 3 : index
    %c0_32 = arith.constant 0 : index
    %c0_33 = arith.constant 0 : index
    %33 = vector.load %arg3[%c3_31, %c0_32, %c0_33] : memref<4x128x256xbf16, #tpu.memory_space<vmem>>, vector<1x128x256xbf16>
    %34 = vector.shape_cast %33 : vector<1x128x256xbf16> to vector<128x256xbf16>
    %cst_34 = arith.constant dense<0.000000e+00> : vector<128x128xf32>
    %35 = tpu.matmul %34, %3, %cst_34 {dimension_numbers = #tpu.dot_dimension_numbers<[1], [0], [0], [1], [0, 0, 1, 1], [], []>} : vector<128x256xbf16>, vector<256x128xbf16>, vector<128x128xf32> -> vector<128x128xf32>
    %36 = arith.addf %32, %35 : vector<128x128xf32>
    %c3_35 = arith.constant 3 : index
    %c0_36 = arith.constant 0 : index
    %c0_37 = arith.constant 0 : index
    %37 = vector.load %arg8[%c3_35, %c0_36, %c0_37] : memref<4x128x128xf32, #tpu.memory_space<vmem>>, vector<1x128x128xf32>
    %38 = vector.shape_cast %37 : vector<1x128x128xf32> to vector<128x128xf32>
    %39 = vector.shape_cast %36 : vector<128x128xf32> to vector<1x128x128xf32>
    tpu.vector_store %arg8[%c3_35, %c0_36, %c0_37], %39 {strides = array<i32>} : memref<4x128x128xf32, #tpu.memory_space<vmem>>, vector<1x128x128xf32>,
    %c0_i32_38 = arith.constant 0 : i32
    %40 = arith.cmpi eq, %arg2, %c0_i32_38 : i32
    %41 = arith.extui %40 : i1 to i32
    %c0_i32_39 = arith.constant 0 : i32
    %42 = arith.cmpi ne, %41, %c0_i32_39 : i32
    scf.if %42 {
      %c0_40 = arith.constant 0 : index
      %c0_41 = arith.constant 0 : index
      %43 = vector.load %arg5[%c0_40, %c0_41] : memref<1x128xf32, #tpu.memory_space<vmem>>, vector<1x128xf32>
      %c0_42 = arith.constant 0 : index
      %c0_43 = arith.constant 0 : index
      %44 = vector.load %arg6[%c0_42, %c0_43] : memref<1x128xf32, #tpu.memory_space<vmem>>, vector<1x128xf32>
      %c0_44 = arith.constant 0 : index
      %c0_45 = arith.constant 0 : index
      %c0_46 = arith.constant 0 : index
      %45 = vector.load %arg8[%c0_44, %c0_45, %c0_46] : memref<4x128x128xf32, #tpu.memory_space<vmem>>, vector<1x128x128xf32>
      %46 = vector.shape_cast %45 : vector<1x128x128xf32> to vector<128x128xf32>
      %47 = vector.broadcast %43 : vector<1x128xf32> to vector<128x128xf32>
      %48 = arith.mulf %46, %47 : vector<128x128xf32>
      %49 = vector.broadcast %44 : vector<1x128xf32> to vector<128x128xf32>
      %50 = arith.addf %48, %49 : vector<128x128xf32>
      %cst_47 = arith.constant 0.000000e+00 : f32
      %51 = vector.broadcast %cst_47 : f32 to vector<128x128xf32>
      %52 = arith.maximumf %50, %51 : vector<128x128xf32>
      %c1_48 = arith.constant 1 : index
      %c0_49 = arith.constant 0 : index
      %c0_50 = arith.constant 0 : index
      %53 = vector.load %arg8[%c1_48, %c0_49, %c0_50] : memref<4x128x128xf32, #tpu.memory_space<vmem>>, vector<1x128x128xf32>
      %54 = vector.shape_cast %53 : vector<1x128x128xf32> to vector<128x128xf32>
      %55 = vector.broadcast %43 : vector<1x128xf32> to vector<128x128xf32>
      %56 = arith.mulf %54, %55 : vector<128x128xf32>
      %57 = vector.broadcast %44 : vector<1x128xf32> to vector<128x128xf32>
      %58 = arith.addf %56, %57 : vector<128x128xf32>
      %cst_51 = arith.constant 0.000000e+00 : f32
      %59 = vector.broadcast %cst_51 : f32 to vector<128x128xf32>
      %60 = arith.maximumf %58, %59 : vector<128x128xf32>
      %61 = arith.maximumf %52, %60 : vector<128x128xf32>
      %c2_52 = arith.constant 2 : index
      %c0_53 = arith.constant 0 : index
      %c0_54 = arith.constant 0 : index
      %62 = vector.load %arg8[%c2_52, %c0_53, %c0_54] : memref<4x128x128xf32, #tpu.memory_space<vmem>>, vector<1x128x128xf32>
      %63 = vector.shape_cast %62 : vector<1x128x128xf32> to vector<128x128xf32>
      %64 = vector.broadcast %43 : vector<1x128xf32> to vector<128x128xf32>
      %65 = arith.mulf %63, %64 : vector<128x128xf32>
      %66 = vector.broadcast %44 : vector<1x128xf32> to vector<128x128xf32>
      %67 = arith.addf %65, %66 : vector<128x128xf32>
      %cst_55 = arith.constant 0.000000e+00 : f32
      %68 = vector.broadcast %cst_55 : f32 to vector<128x128xf32>
      %69 = arith.maximumf %67, %68 : vector<128x128xf32>
      %70 = arith.maximumf %61, %69 : vector<128x128xf32>
      %c3_56 = arith.constant 3 : index
      %c0_57 = arith.constant 0 : index
      %c0_58 = arith.constant 0 : index
      %71 = vector.load %arg8[%c3_56, %c0_57, %c0_58] : memref<4x128x128xf32, #tpu.memory_space<vmem>>, vector<1x128x128xf32>
      %72 = vector.shape_cast %71 : vector<1x128x128xf32> to vector<128x128xf32>
      %73 = vector.broadcast %43 : vector<1x128xf32> to vector<128x128xf32>
      %74 = arith.mulf %72, %73 : vector<128x128xf32>
      %75 = vector.broadcast %44 : vector<1x128xf32> to vector<128x128xf32>
      %76 = arith.addf %74, %75 : vector<128x128xf32>
      %cst_59 = arith.constant 0.000000e+00 : f32
      %77 = vector.broadcast %cst_59 : f32 to vector<128x128xf32>
      %78 = arith.maximumf %76, %77 : vector<128x128xf32>
      %79 = arith.maximumf %70, %78 : vector<128x128xf32>
      %80 = arith.truncf %79 : vector<128x128xf32> to vector<128x128xbf16>
      %c0_60 = arith.constant 0 : index
      %c0_61 = arith.constant 0 : index
      %81 = vector.load %arg7[%c0_60, %c0_61] : memref<128x128xbf16, #tpu.memory_space<vmem>>, vector<128x128xbf16>
      tpu.vector_store %arg7[%c0_60, %c0_61], %80 {strides = array<i32>} : memref<128x128xbf16, #tpu.memory_space<vmem>>, vector<128x128xbf16>,
    } else {
    }
    return
  }
  func.func @transform_0(%arg0: i32, %arg1: i32, %arg2: i32) -> (i32, i32, i32) {
    %c0_i32 = arith.constant 0 : i32
    %c0_i32_0 = arith.constant 0 : i32
    return %c0_i32, %arg0, %arg2 : i32, i32, i32
  }
  func.func @transform_1(%arg0: i32, %arg1: i32, %arg2: i32) -> (i32, i32) {
    %c0_i32 = arith.constant 0 : i32
    return %arg2, %arg1 : i32, i32
  }
  func.func @transform_2(%arg0: i32, %arg1: i32, %arg2: i32) -> (i32, i32) {
    %c0_i32 = arith.constant 0 : i32
    %c0_i32_0 = arith.constant 0 : i32
    return %c0_i32, %arg1 : i32, i32
  }
  func.func @transform_3(%arg0: i32, %arg1: i32, %arg2: i32) -> (i32, i32) {
    %c0_i32 = arith.constant 0 : i32
    %c0_i32_0 = arith.constant 0 : i32
    return %c0_i32, %arg1 : i32, i32
  }
  func.func @transform_4(%arg0: i32, %arg1: i32, %arg2: i32) -> (i32, i32) {
    %c0_i32 = arith.constant 0 : i32
    return %arg0, %arg1 : i32, i32
  }
}

module attributes {stable_mosaic.version = 11 : i64} {
  func.func @_conv_gemm_bn_relu_pool_kernel(%arg0: i32, %arg1: i32, %arg2: i32, %arg3: memref<4x32x128xbf16, #tpu.memory_space<vmem>>, %arg4: memref<128x128xbf16, #tpu.memory_space<vmem>>, %arg5: memref<1x128xf32, #tpu.memory_space<vmem>>, %arg6: memref<1x128xf32, #tpu.memory_space<vmem>>, %arg7: memref<32x128xbf16, #tpu.memory_space<vmem>>, %arg8: memref<4x32x128xf32, #tpu.memory_space<vmem>>) attributes {dimension_semantics = [#tpu.dimension_semantics<parallel>, #tpu.dimension_semantics<parallel>, #tpu.dimension_semantics<arbitrary>], iteration_bounds = array<i64: 1, 1, 1>, scalar_prefetch = 0 : i64, scratch_operands = 1 : i64, tpu.core_type = #tpu.core_type<tc>, window_params = [{transform_indices = @transform_0, window_bounds = array<i64: 4, 32, 128>}, {transform_indices = @transform_1, window_bounds = array<i64: 128, 128>}, {transform_indices = @transform_2, window_bounds = array<i64: 1, 128>}, {transform_indices = @transform_3, window_bounds = array<i64: 1, 128>}, {transform_indices = @transform_4, window_bounds = array<i64: 32, 128>}]} {
    %c0_i32 = arith.constant 0 : i32
    %0 = arith.cmpi eq, %arg2, %c0_i32 : i32
    %1 = arith.extui %0 : i1 to i32
    %c0_i32_0 = arith.constant 0 : i32
    %2 = arith.cmpi ne, %1, %c0_i32_0 : i32
    scf.if %2 {
      %cst_40 = arith.constant 0.000000e+00 : f32
      %43 = vector.broadcast %cst_40 : f32 to vector<4x32x128xf32>
      %c0_41 = arith.constant 0 : index
      %c0_42 = arith.constant 0 : index
      %c0_43 = arith.constant 0 : index
      %44 = vector.load %arg8[%c0_41, %c0_42, %c0_43] : memref<4x32x128xf32, #tpu.memory_space<vmem>>, vector<4x32x128xf32>
      tpu.vector_store %arg8[%c0_41, %c0_42, %c0_43], %43 {strides = array<i32>} : memref<4x32x128xf32, #tpu.memory_space<vmem>>, vector<4x32x128xf32>,
    } else {
    }
    %c0 = arith.constant 0 : index
    %c0_1 = arith.constant 0 : index
    %3 = vector.load %arg4[%c0, %c0_1] : memref<128x128xbf16, #tpu.memory_space<vmem>>, vector<128x128xbf16>
    %c0_2 = arith.constant 0 : index
    %c0_3 = arith.constant 0 : index
    %c0_4 = arith.constant 0 : index
    %4 = vector.load %arg8[%c0_2, %c0_3, %c0_4] : memref<4x32x128xf32, #tpu.memory_space<vmem>>, vector<1x32x128xf32>
    %5 = vector.shape_cast %4 : vector<1x32x128xf32> to vector<32x128xf32>
    %c0_5 = arith.constant 0 : index
    %c0_6 = arith.constant 0 : index
    %c0_7 = arith.constant 0 : index
    %6 = vector.load %arg3[%c0_5, %c0_6, %c0_7] : memref<4x32x128xbf16, #tpu.memory_space<vmem>>, vector<1x32x128xbf16>
    %7 = vector.shape_cast %6 : vector<1x32x128xbf16> to vector<32x128xbf16>
    %cst = arith.constant dense<0.000000e+00> : vector<32x128xf32>
    %8 = tpu.matmul %7, %3, %cst {dimension_numbers = #tpu.dot_dimension_numbers<[1], [0], [0], [1], [0, 0, 1, 1], [], []>} : vector<32x128xbf16>, vector<128x128xbf16>, vector<32x128xf32> -> vector<32x128xf32>
    %9 = arith.addf %5, %8 : vector<32x128xf32>
    %c0_8 = arith.constant 0 : index
    %c0_9 = arith.constant 0 : index
    %c0_10 = arith.constant 0 : index
    %10 = vector.load %arg8[%c0_8, %c0_9, %c0_10] : memref<4x32x128xf32, #tpu.memory_space<vmem>>, vector<1x32x128xf32>
    %11 = vector.shape_cast %10 : vector<1x32x128xf32> to vector<32x128xf32>
    %12 = vector.shape_cast %9 : vector<32x128xf32> to vector<1x32x128xf32>
    tpu.vector_store %arg8[%c0_8, %c0_9, %c0_10], %12 {strides = array<i32>} : memref<4x32x128xf32, #tpu.memory_space<vmem>>, vector<1x32x128xf32>,
    %c1 = arith.constant 1 : index
    %c0_11 = arith.constant 0 : index
    %c0_12 = arith.constant 0 : index
    %13 = vector.load %arg8[%c1, %c0_11, %c0_12] : memref<4x32x128xf32, #tpu.memory_space<vmem>>, vector<1x32x128xf32>
    %14 = vector.shape_cast %13 : vector<1x32x128xf32> to vector<32x128xf32>
    %c1_13 = arith.constant 1 : index
    %c0_14 = arith.constant 0 : index
    %c0_15 = arith.constant 0 : index
    %15 = vector.load %arg3[%c1_13, %c0_14, %c0_15] : memref<4x32x128xbf16, #tpu.memory_space<vmem>>, vector<1x32x128xbf16>
    %16 = vector.shape_cast %15 : vector<1x32x128xbf16> to vector<32x128xbf16>
    %cst_16 = arith.constant dense<0.000000e+00> : vector<32x128xf32>
    %17 = tpu.matmul %16, %3, %cst_16 {dimension_numbers = #tpu.dot_dimension_numbers<[1], [0], [0], [1], [0, 0, 1, 1], [], []>} : vector<32x128xbf16>, vector<128x128xbf16>, vector<32x128xf32> -> vector<32x128xf32>
    %18 = arith.addf %14, %17 : vector<32x128xf32>
    %c1_17 = arith.constant 1 : index
    %c0_18 = arith.constant 0 : index
    %c0_19 = arith.constant 0 : index
    %19 = vector.load %arg8[%c1_17, %c0_18, %c0_19] : memref<4x32x128xf32, #tpu.memory_space<vmem>>, vector<1x32x128xf32>
    %20 = vector.shape_cast %19 : vector<1x32x128xf32> to vector<32x128xf32>
    %21 = vector.shape_cast %18 : vector<32x128xf32> to vector<1x32x128xf32>
    tpu.vector_store %arg8[%c1_17, %c0_18, %c0_19], %21 {strides = array<i32>} : memref<4x32x128xf32, #tpu.memory_space<vmem>>, vector<1x32x128xf32>,
    %c2 = arith.constant 2 : index
    %c0_20 = arith.constant 0 : index
    %c0_21 = arith.constant 0 : index
    %22 = vector.load %arg8[%c2, %c0_20, %c0_21] : memref<4x32x128xf32, #tpu.memory_space<vmem>>, vector<1x32x128xf32>
    %23 = vector.shape_cast %22 : vector<1x32x128xf32> to vector<32x128xf32>
    %c2_22 = arith.constant 2 : index
    %c0_23 = arith.constant 0 : index
    %c0_24 = arith.constant 0 : index
    %24 = vector.load %arg3[%c2_22, %c0_23, %c0_24] : memref<4x32x128xbf16, #tpu.memory_space<vmem>>, vector<1x32x128xbf16>
    %25 = vector.shape_cast %24 : vector<1x32x128xbf16> to vector<32x128xbf16>
    %cst_25 = arith.constant dense<0.000000e+00> : vector<32x128xf32>
    %26 = tpu.matmul %25, %3, %cst_25 {dimension_numbers = #tpu.dot_dimension_numbers<[1], [0], [0], [1], [0, 0, 1, 1], [], []>} : vector<32x128xbf16>, vector<128x128xbf16>, vector<32x128xf32> -> vector<32x128xf32>
    %27 = arith.addf %23, %26 : vector<32x128xf32>
    %c2_26 = arith.constant 2 : index
    %c0_27 = arith.constant 0 : index
    %c0_28 = arith.constant 0 : index
    %28 = vector.load %arg8[%c2_26, %c0_27, %c0_28] : memref<4x32x128xf32, #tpu.memory_space<vmem>>, vector<1x32x128xf32>
    %29 = vector.shape_cast %28 : vector<1x32x128xf32> to vector<32x128xf32>
    %30 = vector.shape_cast %27 : vector<32x128xf32> to vector<1x32x128xf32>
    tpu.vector_store %arg8[%c2_26, %c0_27, %c0_28], %30 {strides = array<i32>} : memref<4x32x128xf32, #tpu.memory_space<vmem>>, vector<1x32x128xf32>,
    %c3 = arith.constant 3 : index
    %c0_29 = arith.constant 0 : index
    %c0_30 = arith.constant 0 : index
    %31 = vector.load %arg8[%c3, %c0_29, %c0_30] : memref<4x32x128xf32, #tpu.memory_space<vmem>>, vector<1x32x128xf32>
    %32 = vector.shape_cast %31 : vector<1x32x128xf32> to vector<32x128xf32>
    %c3_31 = arith.constant 3 : index
    %c0_32 = arith.constant 0 : index
    %c0_33 = arith.constant 0 : index
    %33 = vector.load %arg3[%c3_31, %c0_32, %c0_33] : memref<4x32x128xbf16, #tpu.memory_space<vmem>>, vector<1x32x128xbf16>
    %34 = vector.shape_cast %33 : vector<1x32x128xbf16> to vector<32x128xbf16>
    %cst_34 = arith.constant dense<0.000000e+00> : vector<32x128xf32>
    %35 = tpu.matmul %34, %3, %cst_34 {dimension_numbers = #tpu.dot_dimension_numbers<[1], [0], [0], [1], [0, 0, 1, 1], [], []>} : vector<32x128xbf16>, vector<128x128xbf16>, vector<32x128xf32> -> vector<32x128xf32>
    %36 = arith.addf %32, %35 : vector<32x128xf32>
    %c3_35 = arith.constant 3 : index
    %c0_36 = arith.constant 0 : index
    %c0_37 = arith.constant 0 : index
    %37 = vector.load %arg8[%c3_35, %c0_36, %c0_37] : memref<4x32x128xf32, #tpu.memory_space<vmem>>, vector<1x32x128xf32>
    %38 = vector.shape_cast %37 : vector<1x32x128xf32> to vector<32x128xf32>
    %39 = vector.shape_cast %36 : vector<32x128xf32> to vector<1x32x128xf32>
    tpu.vector_store %arg8[%c3_35, %c0_36, %c0_37], %39 {strides = array<i32>} : memref<4x32x128xf32, #tpu.memory_space<vmem>>, vector<1x32x128xf32>,
    %c0_i32_38 = arith.constant 0 : i32
    %40 = arith.cmpi eq, %arg2, %c0_i32_38 : i32
    %41 = arith.extui %40 : i1 to i32
    %c0_i32_39 = arith.constant 0 : i32
    %42 = arith.cmpi ne, %41, %c0_i32_39 : i32
    scf.if %42 {
      %c0_40 = arith.constant 0 : index
      %c0_41 = arith.constant 0 : index
      %43 = vector.load %arg5[%c0_40, %c0_41] : memref<1x128xf32, #tpu.memory_space<vmem>>, vector<1x128xf32>
      %c0_42 = arith.constant 0 : index
      %c0_43 = arith.constant 0 : index
      %44 = vector.load %arg6[%c0_42, %c0_43] : memref<1x128xf32, #tpu.memory_space<vmem>>, vector<1x128xf32>
      %c0_44 = arith.constant 0 : index
      %c0_45 = arith.constant 0 : index
      %c0_46 = arith.constant 0 : index
      %45 = vector.load %arg8[%c0_44, %c0_45, %c0_46] : memref<4x32x128xf32, #tpu.memory_space<vmem>>, vector<1x32x128xf32>
      %46 = vector.shape_cast %45 : vector<1x32x128xf32> to vector<32x128xf32>
      %47 = vector.broadcast %43 : vector<1x128xf32> to vector<32x128xf32>
      %48 = arith.mulf %46, %47 : vector<32x128xf32>
      %49 = vector.broadcast %44 : vector<1x128xf32> to vector<32x128xf32>
      %50 = arith.addf %48, %49 : vector<32x128xf32>
      %cst_47 = arith.constant 0.000000e+00 : f32
      %51 = vector.broadcast %cst_47 : f32 to vector<32x128xf32>
      %52 = arith.maximumf %50, %51 : vector<32x128xf32>
      %c1_48 = arith.constant 1 : index
      %c0_49 = arith.constant 0 : index
      %c0_50 = arith.constant 0 : index
      %53 = vector.load %arg8[%c1_48, %c0_49, %c0_50] : memref<4x32x128xf32, #tpu.memory_space<vmem>>, vector<1x32x128xf32>
      %54 = vector.shape_cast %53 : vector<1x32x128xf32> to vector<32x128xf32>
      %55 = vector.broadcast %43 : vector<1x128xf32> to vector<32x128xf32>
      %56 = arith.mulf %54, %55 : vector<32x128xf32>
      %57 = vector.broadcast %44 : vector<1x128xf32> to vector<32x128xf32>
      %58 = arith.addf %56, %57 : vector<32x128xf32>
      %cst_51 = arith.constant 0.000000e+00 : f32
      %59 = vector.broadcast %cst_51 : f32 to vector<32x128xf32>
      %60 = arith.maximumf %58, %59 : vector<32x128xf32>
      %61 = arith.maximumf %52, %60 : vector<32x128xf32>
      %c2_52 = arith.constant 2 : index
      %c0_53 = arith.constant 0 : index
      %c0_54 = arith.constant 0 : index
      %62 = vector.load %arg8[%c2_52, %c0_53, %c0_54] : memref<4x32x128xf32, #tpu.memory_space<vmem>>, vector<1x32x128xf32>
      %63 = vector.shape_cast %62 : vector<1x32x128xf32> to vector<32x128xf32>
      %64 = vector.broadcast %43 : vector<1x128xf32> to vector<32x128xf32>
      %65 = arith.mulf %63, %64 : vector<32x128xf32>
      %66 = vector.broadcast %44 : vector<1x128xf32> to vector<32x128xf32>
      %67 = arith.addf %65, %66 : vector<32x128xf32>
      %cst_55 = arith.constant 0.000000e+00 : f32
      %68 = vector.broadcast %cst_55 : f32 to vector<32x128xf32>
      %69 = arith.maximumf %67, %68 : vector<32x128xf32>
      %70 = arith.maximumf %61, %69 : vector<32x128xf32>
      %c3_56 = arith.constant 3 : index
      %c0_57 = arith.constant 0 : index
      %c0_58 = arith.constant 0 : index
      %71 = vector.load %arg8[%c3_56, %c0_57, %c0_58] : memref<4x32x128xf32, #tpu.memory_space<vmem>>, vector<1x32x128xf32>
      %72 = vector.shape_cast %71 : vector<1x32x128xf32> to vector<32x128xf32>
      %73 = vector.broadcast %43 : vector<1x128xf32> to vector<32x128xf32>
      %74 = arith.mulf %72, %73 : vector<32x128xf32>
      %75 = vector.broadcast %44 : vector<1x128xf32> to vector<32x128xf32>
      %76 = arith.addf %74, %75 : vector<32x128xf32>
      %cst_59 = arith.constant 0.000000e+00 : f32
      %77 = vector.broadcast %cst_59 : f32 to vector<32x128xf32>
      %78 = arith.maximumf %76, %77 : vector<32x128xf32>
      %79 = arith.maximumf %70, %78 : vector<32x128xf32>
      %80 = arith.truncf %79 : vector<32x128xf32> to vector<32x128xbf16>
      %c0_60 = arith.constant 0 : index
      %c0_61 = arith.constant 0 : index
      %81 = vector.load %arg7[%c0_60, %c0_61] : memref<32x128xbf16, #tpu.memory_space<vmem>>, vector<32x128xbf16>
      tpu.vector_store %arg7[%c0_60, %c0_61], %80 {strides = array<i32>} : memref<32x128xbf16, #tpu.memory_space<vmem>>, vector<32x128xbf16>,
    } else {
    }
    return
  }
  func.func @transform_0(%arg0: i32, %arg1: i32, %arg2: i32) -> (i32, i32, i32) {
    %c0_i32 = arith.constant 0 : i32
    %c0_i32_0 = arith.constant 0 : i32
    return %c0_i32, %arg0, %arg2 : i32, i32, i32
  }
  func.func @transform_1(%arg0: i32, %arg1: i32, %arg2: i32) -> (i32, i32) {
    %c0_i32 = arith.constant 0 : i32
    return %arg2, %arg1 : i32, i32
  }
  func.func @transform_2(%arg0: i32, %arg1: i32, %arg2: i32) -> (i32, i32) {
    %c0_i32 = arith.constant 0 : i32
    %c0_i32_0 = arith.constant 0 : i32
    return %c0_i32, %arg1 : i32, i32
  }
  func.func @transform_3(%arg0: i32, %arg1: i32, %arg2: i32) -> (i32, i32) {
    %c0_i32 = arith.constant 0 : i32
    %c0_i32_0 = arith.constant 0 : i32
    return %c0_i32, %arg1 : i32, i32
  }
  func.func @transform_4(%arg0: i32, %arg1: i32, %arg2: i32) -> (i32, i32) {
    %c0_i32 = arith.constant 0 : i32
    return %arg0, %arg1 : i32, i32
  }
}

module attributes {stable_mosaic.version = 11 : i64} {
  func.func @_conv_gemm_bn_relu_pool_kernel(%arg0: i32, %arg1: i32, %arg2: i32, %arg3: memref<4x8x256xbf16, #tpu.memory_space<vmem>>, %arg4: memref<256x128xbf16, #tpu.memory_space<vmem>>, %arg5: memref<1x128xf32, #tpu.memory_space<vmem>>, %arg6: memref<1x128xf32, #tpu.memory_space<vmem>>, %arg7: memref<8x128xbf16, #tpu.memory_space<vmem>>, %arg8: memref<4x8x128xf32, #tpu.memory_space<vmem>>) attributes {dimension_semantics = [#tpu.dimension_semantics<parallel>, #tpu.dimension_semantics<parallel>, #tpu.dimension_semantics<arbitrary>], iteration_bounds = array<i64: 1, 1, 1>, scalar_prefetch = 0 : i64, scratch_operands = 1 : i64, tpu.core_type = #tpu.core_type<tc>, window_params = [{transform_indices = @transform_0, window_bounds = array<i64: 4, 8, 256>}, {transform_indices = @transform_1, window_bounds = array<i64: 256, 128>}, {transform_indices = @transform_2, window_bounds = array<i64: 1, 128>}, {transform_indices = @transform_3, window_bounds = array<i64: 1, 128>}, {transform_indices = @transform_4, window_bounds = array<i64: 8, 128>}]} {
    %c0_i32 = arith.constant 0 : i32
    %0 = arith.cmpi eq, %arg2, %c0_i32 : i32
    %1 = arith.extui %0 : i1 to i32
    %c0_i32_0 = arith.constant 0 : i32
    %2 = arith.cmpi ne, %1, %c0_i32_0 : i32
    scf.if %2 {
      %cst_40 = arith.constant 0.000000e+00 : f32
      %43 = vector.broadcast %cst_40 : f32 to vector<4x8x128xf32>
      %c0_41 = arith.constant 0 : index
      %c0_42 = arith.constant 0 : index
      %c0_43 = arith.constant 0 : index
      %44 = vector.load %arg8[%c0_41, %c0_42, %c0_43] : memref<4x8x128xf32, #tpu.memory_space<vmem>>, vector<4x8x128xf32>
      tpu.vector_store %arg8[%c0_41, %c0_42, %c0_43], %43 {strides = array<i32>} : memref<4x8x128xf32, #tpu.memory_space<vmem>>, vector<4x8x128xf32>,
    } else {
    }
    %c0 = arith.constant 0 : index
    %c0_1 = arith.constant 0 : index
    %3 = vector.load %arg4[%c0, %c0_1] : memref<256x128xbf16, #tpu.memory_space<vmem>>, vector<256x128xbf16>
    %c0_2 = arith.constant 0 : index
    %c0_3 = arith.constant 0 : index
    %c0_4 = arith.constant 0 : index
    %4 = vector.load %arg8[%c0_2, %c0_3, %c0_4] : memref<4x8x128xf32, #tpu.memory_space<vmem>>, vector<1x8x128xf32>
    %5 = vector.shape_cast %4 : vector<1x8x128xf32> to vector<8x128xf32>
    %c0_5 = arith.constant 0 : index
    %c0_6 = arith.constant 0 : index
    %c0_7 = arith.constant 0 : index
    %6 = vector.load %arg3[%c0_5, %c0_6, %c0_7] : memref<4x8x256xbf16, #tpu.memory_space<vmem>>, vector<1x8x256xbf16>
    %7 = vector.shape_cast %6 : vector<1x8x256xbf16> to vector<8x256xbf16>
    %cst = arith.constant dense<0.000000e+00> : vector<8x128xf32>
    %8 = tpu.matmul %7, %3, %cst {dimension_numbers = #tpu.dot_dimension_numbers<[1], [0], [0], [1], [0, 0, 1, 1], [], []>} : vector<8x256xbf16>, vector<256x128xbf16>, vector<8x128xf32> -> vector<8x128xf32>
    %9 = arith.addf %5, %8 : vector<8x128xf32>
    %c0_8 = arith.constant 0 : index
    %c0_9 = arith.constant 0 : index
    %c0_10 = arith.constant 0 : index
    %10 = vector.load %arg8[%c0_8, %c0_9, %c0_10] : memref<4x8x128xf32, #tpu.memory_space<vmem>>, vector<1x8x128xf32>
    %11 = vector.shape_cast %10 : vector<1x8x128xf32> to vector<8x128xf32>
    %12 = vector.shape_cast %9 : vector<8x128xf32> to vector<1x8x128xf32>
    tpu.vector_store %arg8[%c0_8, %c0_9, %c0_10], %12 {strides = array<i32>} : memref<4x8x128xf32, #tpu.memory_space<vmem>>, vector<1x8x128xf32>,
    %c1 = arith.constant 1 : index
    %c0_11 = arith.constant 0 : index
    %c0_12 = arith.constant 0 : index
    %13 = vector.load %arg8[%c1, %c0_11, %c0_12] : memref<4x8x128xf32, #tpu.memory_space<vmem>>, vector<1x8x128xf32>
    %14 = vector.shape_cast %13 : vector<1x8x128xf32> to vector<8x128xf32>
    %c1_13 = arith.constant 1 : index
    %c0_14 = arith.constant 0 : index
    %c0_15 = arith.constant 0 : index
    %15 = vector.load %arg3[%c1_13, %c0_14, %c0_15] : memref<4x8x256xbf16, #tpu.memory_space<vmem>>, vector<1x8x256xbf16>
    %16 = vector.shape_cast %15 : vector<1x8x256xbf16> to vector<8x256xbf16>
    %cst_16 = arith.constant dense<0.000000e+00> : vector<8x128xf32>
    %17 = tpu.matmul %16, %3, %cst_16 {dimension_numbers = #tpu.dot_dimension_numbers<[1], [0], [0], [1], [0, 0, 1, 1], [], []>} : vector<8x256xbf16>, vector<256x128xbf16>, vector<8x128xf32> -> vector<8x128xf32>
    %18 = arith.addf %14, %17 : vector<8x128xf32>
    %c1_17 = arith.constant 1 : index
    %c0_18 = arith.constant 0 : index
    %c0_19 = arith.constant 0 : index
    %19 = vector.load %arg8[%c1_17, %c0_18, %c0_19] : memref<4x8x128xf32, #tpu.memory_space<vmem>>, vector<1x8x128xf32>
    %20 = vector.shape_cast %19 : vector<1x8x128xf32> to vector<8x128xf32>
    %21 = vector.shape_cast %18 : vector<8x128xf32> to vector<1x8x128xf32>
    tpu.vector_store %arg8[%c1_17, %c0_18, %c0_19], %21 {strides = array<i32>} : memref<4x8x128xf32, #tpu.memory_space<vmem>>, vector<1x8x128xf32>,
    %c2 = arith.constant 2 : index
    %c0_20 = arith.constant 0 : index
    %c0_21 = arith.constant 0 : index
    %22 = vector.load %arg8[%c2, %c0_20, %c0_21] : memref<4x8x128xf32, #tpu.memory_space<vmem>>, vector<1x8x128xf32>
    %23 = vector.shape_cast %22 : vector<1x8x128xf32> to vector<8x128xf32>
    %c2_22 = arith.constant 2 : index
    %c0_23 = arith.constant 0 : index
    %c0_24 = arith.constant 0 : index
    %24 = vector.load %arg3[%c2_22, %c0_23, %c0_24] : memref<4x8x256xbf16, #tpu.memory_space<vmem>>, vector<1x8x256xbf16>
    %25 = vector.shape_cast %24 : vector<1x8x256xbf16> to vector<8x256xbf16>
    %cst_25 = arith.constant dense<0.000000e+00> : vector<8x128xf32>
    %26 = tpu.matmul %25, %3, %cst_25 {dimension_numbers = #tpu.dot_dimension_numbers<[1], [0], [0], [1], [0, 0, 1, 1], [], []>} : vector<8x256xbf16>, vector<256x128xbf16>, vector<8x128xf32> -> vector<8x128xf32>
    %27 = arith.addf %23, %26 : vector<8x128xf32>
    %c2_26 = arith.constant 2 : index
    %c0_27 = arith.constant 0 : index
    %c0_28 = arith.constant 0 : index
    %28 = vector.load %arg8[%c2_26, %c0_27, %c0_28] : memref<4x8x128xf32, #tpu.memory_space<vmem>>, vector<1x8x128xf32>
    %29 = vector.shape_cast %28 : vector<1x8x128xf32> to vector<8x128xf32>
    %30 = vector.shape_cast %27 : vector<8x128xf32> to vector<1x8x128xf32>
    tpu.vector_store %arg8[%c2_26, %c0_27, %c0_28], %30 {strides = array<i32>} : memref<4x8x128xf32, #tpu.memory_space<vmem>>, vector<1x8x128xf32>,
    %c3 = arith.constant 3 : index
    %c0_29 = arith.constant 0 : index
    %c0_30 = arith.constant 0 : index
    %31 = vector.load %arg8[%c3, %c0_29, %c0_30] : memref<4x8x128xf32, #tpu.memory_space<vmem>>, vector<1x8x128xf32>
    %32 = vector.shape_cast %31 : vector<1x8x128xf32> to vector<8x128xf32>
    %c3_31 = arith.constant 3 : index
    %c0_32 = arith.constant 0 : index
    %c0_33 = arith.constant 0 : index
    %33 = vector.load %arg3[%c3_31, %c0_32, %c0_33] : memref<4x8x256xbf16, #tpu.memory_space<vmem>>, vector<1x8x256xbf16>
    %34 = vector.shape_cast %33 : vector<1x8x256xbf16> to vector<8x256xbf16>
    %cst_34 = arith.constant dense<0.000000e+00> : vector<8x128xf32>
    %35 = tpu.matmul %34, %3, %cst_34 {dimension_numbers = #tpu.dot_dimension_numbers<[1], [0], [0], [1], [0, 0, 1, 1], [], []>} : vector<8x256xbf16>, vector<256x128xbf16>, vector<8x128xf32> -> vector<8x128xf32>
    %36 = arith.addf %32, %35 : vector<8x128xf32>
    %c3_35 = arith.constant 3 : index
    %c0_36 = arith.constant 0 : index
    %c0_37 = arith.constant 0 : index
    %37 = vector.load %arg8[%c3_35, %c0_36, %c0_37] : memref<4x8x128xf32, #tpu.memory_space<vmem>>, vector<1x8x128xf32>
    %38 = vector.shape_cast %37 : vector<1x8x128xf32> to vector<8x128xf32>
    %39 = vector.shape_cast %36 : vector<8x128xf32> to vector<1x8x128xf32>
    tpu.vector_store %arg8[%c3_35, %c0_36, %c0_37], %39 {strides = array<i32>} : memref<4x8x128xf32, #tpu.memory_space<vmem>>, vector<1x8x128xf32>,
    %c0_i32_38 = arith.constant 0 : i32
    %40 = arith.cmpi eq, %arg2, %c0_i32_38 : i32
    %41 = arith.extui %40 : i1 to i32
    %c0_i32_39 = arith.constant 0 : i32
    %42 = arith.cmpi ne, %41, %c0_i32_39 : i32
    scf.if %42 {
      %c0_40 = arith.constant 0 : index
      %c0_41 = arith.constant 0 : index
      %43 = vector.load %arg5[%c0_40, %c0_41] : memref<1x128xf32, #tpu.memory_space<vmem>>, vector<1x128xf32>
      %c0_42 = arith.constant 0 : index
      %c0_43 = arith.constant 0 : index
      %44 = vector.load %arg6[%c0_42, %c0_43] : memref<1x128xf32, #tpu.memory_space<vmem>>, vector<1x128xf32>
      %c0_44 = arith.constant 0 : index
      %c0_45 = arith.constant 0 : index
      %c0_46 = arith.constant 0 : index
      %45 = vector.load %arg8[%c0_44, %c0_45, %c0_46] : memref<4x8x128xf32, #tpu.memory_space<vmem>>, vector<1x8x128xf32>
      %46 = vector.shape_cast %45 : vector<1x8x128xf32> to vector<8x128xf32>
      %47 = vector.broadcast %43 : vector<1x128xf32> to vector<8x128xf32>
      %48 = arith.mulf %46, %47 : vector<8x128xf32>
      %49 = vector.broadcast %44 : vector<1x128xf32> to vector<8x128xf32>
      %50 = arith.addf %48, %49 : vector<8x128xf32>
      %cst_47 = arith.constant 0.000000e+00 : f32
      %51 = vector.broadcast %cst_47 : f32 to vector<8x128xf32>
      %52 = arith.maximumf %50, %51 : vector<8x128xf32>
      %c1_48 = arith.constant 1 : index
      %c0_49 = arith.constant 0 : index
      %c0_50 = arith.constant 0 : index
      %53 = vector.load %arg8[%c1_48, %c0_49, %c0_50] : memref<4x8x128xf32, #tpu.memory_space<vmem>>, vector<1x8x128xf32>
      %54 = vector.shape_cast %53 : vector<1x8x128xf32> to vector<8x128xf32>
      %55 = vector.broadcast %43 : vector<1x128xf32> to vector<8x128xf32>
      %56 = arith.mulf %54, %55 : vector<8x128xf32>
      %57 = vector.broadcast %44 : vector<1x128xf32> to vector<8x128xf32>
      %58 = arith.addf %56, %57 : vector<8x128xf32>
      %cst_51 = arith.constant 0.000000e+00 : f32
      %59 = vector.broadcast %cst_51 : f32 to vector<8x128xf32>
      %60 = arith.maximumf %58, %59 : vector<8x128xf32>
      %61 = arith.maximumf %52, %60 : vector<8x128xf32>
      %c2_52 = arith.constant 2 : index
      %c0_53 = arith.constant 0 : index
      %c0_54 = arith.constant 0 : index
      %62 = vector.load %arg8[%c2_52, %c0_53, %c0_54] : memref<4x8x128xf32, #tpu.memory_space<vmem>>, vector<1x8x128xf32>
      %63 = vector.shape_cast %62 : vector<1x8x128xf32> to vector<8x128xf32>
      %64 = vector.broadcast %43 : vector<1x128xf32> to vector<8x128xf32>
      %65 = arith.mulf %63, %64 : vector<8x128xf32>
      %66 = vector.broadcast %44 : vector<1x128xf32> to vector<8x128xf32>
      %67 = arith.addf %65, %66 : vector<8x128xf32>
      %cst_55 = arith.constant 0.000000e+00 : f32
      %68 = vector.broadcast %cst_55 : f32 to vector<8x128xf32>
      %69 = arith.maximumf %67, %68 : vector<8x128xf32>
      %70 = arith.maximumf %61, %69 : vector<8x128xf32>
      %c3_56 = arith.constant 3 : index
      %c0_57 = arith.constant 0 : index
      %c0_58 = arith.constant 0 : index
      %71 = vector.load %arg8[%c3_56, %c0_57, %c0_58] : memref<4x8x128xf32, #tpu.memory_space<vmem>>, vector<1x8x128xf32>
      %72 = vector.shape_cast %71 : vector<1x8x128xf32> to vector<8x128xf32>
      %73 = vector.broadcast %43 : vector<1x128xf32> to vector<8x128xf32>
      %74 = arith.mulf %72, %73 : vector<8x128xf32>
      %75 = vector.broadcast %44 : vector<1x128xf32> to vector<8x128xf32>
      %76 = arith.addf %74, %75 : vector<8x128xf32>
      %cst_59 = arith.constant 0.000000e+00 : f32
      %77 = vector.broadcast %cst_59 : f32 to vector<8x128xf32>
      %78 = arith.maximumf %76, %77 : vector<8x128xf32>
      %79 = arith.maximumf %70, %78 : vector<8x128xf32>
      %80 = arith.truncf %79 : vector<8x128xf32> to vector<8x128xbf16>
      %c0_60 = arith.constant 0 : index
      %c0_61 = arith.constant 0 : index
      %81 = vector.load %arg7[%c0_60, %c0_61] : memref<8x128xbf16, #tpu.memory_space<vmem>>, vector<8x128xbf16>
      tpu.vector_store %arg7[%c0_60, %c0_61], %80 {strides = array<i32>} : memref<8x128xbf16, #tpu.memory_space<vmem>>, vector<8x128xbf16>,
    } else {
    }
    return
  }
  func.func @transform_0(%arg0: i32, %arg1: i32, %arg2: i32) -> (i32, i32, i32) {
    %c0_i32 = arith.constant 0 : i32
    %c0_i32_0 = arith.constant 0 : i32
    return %c0_i32, %arg0, %arg2 : i32, i32, i32
  }
  func.func @transform_1(%arg0: i32, %arg1: i32, %arg2: i32) -> (i32, i32) {
    %c0_i32 = arith.constant 0 : i32
    return %arg2, %arg1 : i32, i32
  }
  func.func @transform_2(%arg0: i32, %arg1: i32, %arg2: i32) -> (i32, i32) {
    %c0_i32 = arith.constant 0 : i32
    %c0_i32_0 = arith.constant 0 : i32
    return %c0_i32, %arg1 : i32, i32
  }
  func.func @transform_3(%arg0: i32, %arg1: i32, %arg2: i32) -> (i32, i32) {
    %c0_i32 = arith.constant 0 : i32
    %c0_i32_0 = arith.constant 0 : i32
    return %c0_i32, %arg1 : i32, i32
  }
  func.func @transform_4(%arg0: i32, %arg1: i32, %arg2: i32) -> (i32, i32) {
    %c0_i32 = arith.constant 0 : i32
    return %arg0, %arg1 : i32, i32
  }
}

module attributes {stable_mosaic.version = 11 : i64} {
  func.func @_linear_bias_act_kernel(%arg0: i32, %arg1: i32, %arg2: i32, %arg3: memref<8x128xbf16, #tpu.memory_space<vmem>>, %arg4: memref<128x512xbf16, #tpu.memory_space<vmem>>, %arg5: memref<1x512xf32, #tpu.memory_space<vmem>>, %arg6: memref<8x512xbf16, #tpu.memory_space<vmem>>, %arg7: memref<8x512xf32, #tpu.memory_space<vmem>>) attributes {dimension_semantics = [#tpu.dimension_semantics<parallel>, #tpu.dimension_semantics<parallel>, #tpu.dimension_semantics<arbitrary>], iteration_bounds = array<i64: 1, 1, 1>, scalar_prefetch = 0 : i64, scratch_operands = 1 : i64, tpu.core_type = #tpu.core_type<tc>, window_params = [{transform_indices = @transform_0, window_bounds = array<i64: 8, 128>}, {transform_indices = @transform_1, window_bounds = array<i64: 128, 512>}, {transform_indices = @transform_2, window_bounds = array<i64: 1, 512>}, {transform_indices = @transform_3, window_bounds = array<i64: 8, 512>}]} {
    %c0_i32 = arith.constant 0 : i32
    %0 = arith.cmpi eq, %arg2, %c0_i32 : i32
    %1 = arith.extui %0 : i1 to i32
    %c0_i32_0 = arith.constant 0 : i32
    %2 = arith.cmpi ne, %1, %c0_i32_0 : i32
    scf.if %2 {
      %cst_10 = arith.constant 0.000000e+00 : f32
      %12 = vector.broadcast %cst_10 : f32 to vector<8x512xf32>
      %c0_11 = arith.constant 0 : index
      %c0_12 = arith.constant 0 : index
      %13 = vector.load %arg7[%c0_11, %c0_12] : memref<8x512xf32, #tpu.memory_space<vmem>>, vector<8x512xf32>
      tpu.vector_store %arg7[%c0_11, %c0_12], %12 {strides = array<i32>} : memref<8x512xf32, #tpu.memory_space<vmem>>, vector<8x512xf32>,
    } else {
    }
    %c0 = arith.constant 0 : index
    %c0_1 = arith.constant 0 : index
    %3 = vector.load %arg7[%c0, %c0_1] : memref<8x512xf32, #tpu.memory_space<vmem>>, vector<8x512xf32>
    %c0_2 = arith.constant 0 : index
    %c0_3 = arith.constant 0 : index
    %4 = vector.load %arg3[%c0_2, %c0_3] : memref<8x128xbf16, #tpu.memory_space<vmem>>, vector<8x128xbf16>
    %c0_4 = arith.constant 0 : index
    %c0_5 = arith.constant 0 : index
    %5 = vector.load %arg4[%c0_4, %c0_5] : memref<128x512xbf16, #tpu.memory_space<vmem>>, vector<128x512xbf16>
    %cst = arith.constant dense<0.000000e+00> : vector<8x512xf32>
    %6 = tpu.matmul %4, %5, %cst {dimension_numbers = #tpu.dot_dimension_numbers<[1], [0], [0], [1], [0, 0, 1, 1], [], []>} : vector<8x128xbf16>, vector<128x512xbf16>, vector<8x512xf32> -> vector<8x512xf32>
    %7 = arith.addf %3, %6 : vector<8x512xf32>
    %c0_6 = arith.constant 0 : index
    %c0_7 = arith.constant 0 : index
    %8 = vector.load %arg7[%c0_6, %c0_7] : memref<8x512xf32, #tpu.memory_space<vmem>>, vector<8x512xf32>
    tpu.vector_store %arg7[%c0_6, %c0_7], %7 {strides = array<i32>} : memref<8x512xf32, #tpu.memory_space<vmem>>, vector<8x512xf32>,
    %c0_i32_8 = arith.constant 0 : i32
    %9 = arith.cmpi eq, %arg2, %c0_i32_8 : i32
    %10 = arith.extui %9 : i1 to i32
    %c0_i32_9 = arith.constant 0 : i32
    %11 = arith.cmpi ne, %10, %c0_i32_9 : i32
    scf.if %11 {
      %c0_10 = arith.constant 0 : index
      %c0_11 = arith.constant 0 : index
      %12 = vector.load %arg7[%c0_10, %c0_11] : memref<8x512xf32, #tpu.memory_space<vmem>>, vector<8x512xf32>
      %c0_12 = arith.constant 0 : index
      %c0_13 = arith.constant 0 : index
      %13 = vector.load %arg5[%c0_12, %c0_13] : memref<1x512xf32, #tpu.memory_space<vmem>>, vector<1x512xf32>
      %14 = vector.broadcast %13 : vector<1x512xf32> to vector<8x512xf32>
      %15 = arith.addf %12, %14 : vector<8x512xf32>
      %cst_14 = arith.constant 0.000000e+00 : f32
      %16 = vector.broadcast %cst_14 : f32 to vector<8x512xf32>
      %17 = arith.maximumf %15, %16 : vector<8x512xf32>
      %18 = arith.truncf %17 : vector<8x512xf32> to vector<8x512xbf16>
      %c0_15 = arith.constant 0 : index
      %c0_16 = arith.constant 0 : index
      %19 = vector.load %arg6[%c0_15, %c0_16] : memref<8x512xbf16, #tpu.memory_space<vmem>>, vector<8x512xbf16>
      tpu.vector_store %arg6[%c0_15, %c0_16], %18 {strides = array<i32>} : memref<8x512xbf16, #tpu.memory_space<vmem>>, vector<8x512xbf16>,
    } else {
    }
    return
  }
  func.func @transform_0(%arg0: i32, %arg1: i32, %arg2: i32) -> (i32, i32) {
    %c0_i32 = arith.constant 0 : i32
    return %arg0, %arg2 : i32, i32
  }
  func.func @transform_1(%arg0: i32, %arg1: i32, %arg2: i32) -> (i32, i32) {
    %c0_i32 = arith.constant 0 : i32
    return %arg2, %arg1 : i32, i32
  }
  func.func @transform_2(%arg0: i32, %arg1: i32, %arg2: i32) -> (i32, i32) {
    %c0_i32 = arith.constant 0 : i32
    %c0_i32_0 = arith.constant 0 : i32
    return %c0_i32, %arg1 : i32, i32
  }
  func.func @transform_3(%arg0: i32, %arg1: i32, %arg2: i32) -> (i32, i32) {
    %c0_i32 = arith.constant 0 : i32
    return %arg0, %arg1 : i32, i32
  }
}

module attributes {stable_mosaic.version = 11 : i64} {
  func.func @_linear_bias_act_kernel(%arg0: i32, %arg1: i32, %arg2: i32, %arg3: memref<8x512xbf16, #tpu.memory_space<vmem>>, %arg4: memref<512x128xbf16, #tpu.memory_space<vmem>>, %arg5: memref<1x128xf32, #tpu.memory_space<vmem>>, %arg6: memref<8x128xf32, #tpu.memory_space<vmem>>, %arg7: memref<8x128xf32, #tpu.memory_space<vmem>>) attributes {dimension_semantics = [#tpu.dimension_semantics<parallel>, #tpu.dimension_semantics<parallel>, #tpu.dimension_semantics<arbitrary>], iteration_bounds = array<i64: 1, 1, 1>, scalar_prefetch = 0 : i64, scratch_operands = 1 : i64, tpu.core_type = #tpu.core_type<tc>, window_params = [{transform_indices = @transform_0, window_bounds = array<i64: 8, 512>}, {transform_indices = @transform_1, window_bounds = array<i64: 512, 128>}, {transform_indices = @transform_2, window_bounds = array<i64: 1, 128>}, {transform_indices = @transform_3, window_bounds = array<i64: 8, 128>}]} {
    %c0_i32 = arith.constant 0 : i32
    %0 = arith.cmpi eq, %arg2, %c0_i32 : i32
    %1 = arith.extui %0 : i1 to i32
    %c0_i32_0 = arith.constant 0 : i32
    %2 = arith.cmpi ne, %1, %c0_i32_0 : i32
    scf.if %2 {
      %cst_10 = arith.constant 0.000000e+00 : f32
      %12 = vector.broadcast %cst_10 : f32 to vector<8x128xf32>
      %c0_11 = arith.constant 0 : index
      %c0_12 = arith.constant 0 : index
      %13 = vector.load %arg7[%c0_11, %c0_12] : memref<8x128xf32, #tpu.memory_space<vmem>>, vector<8x128xf32>
      tpu.vector_store %arg7[%c0_11, %c0_12], %12 {strides = array<i32>} : memref<8x128xf32, #tpu.memory_space<vmem>>, vector<8x128xf32>,
    } else {
    }
    %c0 = arith.constant 0 : index
    %c0_1 = arith.constant 0 : index
    %3 = vector.load %arg7[%c0, %c0_1] : memref<8x128xf32, #tpu.memory_space<vmem>>, vector<8x128xf32>
    %c0_2 = arith.constant 0 : index
    %c0_3 = arith.constant 0 : index
    %4 = vector.load %arg3[%c0_2, %c0_3] : memref<8x512xbf16, #tpu.memory_space<vmem>>, vector<8x512xbf16>
    %c0_4 = arith.constant 0 : index
    %c0_5 = arith.constant 0 : index
    %5 = vector.load %arg4[%c0_4, %c0_5] : memref<512x128xbf16, #tpu.memory_space<vmem>>, vector<512x128xbf16>
    %cst = arith.constant dense<0.000000e+00> : vector<8x128xf32>
    %6 = tpu.matmul %4, %5, %cst {dimension_numbers = #tpu.dot_dimension_numbers<[1], [0], [0], [1], [0, 0, 1, 1], [], []>} : vector<8x512xbf16>, vector<512x128xbf16>, vector<8x128xf32> -> vector<8x128xf32>
    %7 = arith.addf %3, %6 : vector<8x128xf32>
    %c0_6 = arith.constant 0 : index
    %c0_7 = arith.constant 0 : index
    %8 = vector.load %arg7[%c0_6, %c0_7] : memref<8x128xf32, #tpu.memory_space<vmem>>, vector<8x128xf32>
    tpu.vector_store %arg7[%c0_6, %c0_7], %7 {strides = array<i32>} : memref<8x128xf32, #tpu.memory_space<vmem>>, vector<8x128xf32>,
    %c0_i32_8 = arith.constant 0 : i32
    %9 = arith.cmpi eq, %arg2, %c0_i32_8 : i32
    %10 = arith.extui %9 : i1 to i32
    %c0_i32_9 = arith.constant 0 : i32
    %11 = arith.cmpi ne, %10, %c0_i32_9 : i32
    scf.if %11 {
      %c0_10 = arith.constant 0 : index
      %c0_11 = arith.constant 0 : index
      %12 = vector.load %arg7[%c0_10, %c0_11] : memref<8x128xf32, #tpu.memory_space<vmem>>, vector<8x128xf32>
      %c0_12 = arith.constant 0 : index
      %c0_13 = arith.constant 0 : index
      %13 = vector.load %arg5[%c0_12, %c0_13] : memref<1x128xf32, #tpu.memory_space<vmem>>, vector<1x128xf32>
      %14 = vector.broadcast %13 : vector<1x128xf32> to vector<8x128xf32>
      %15 = arith.addf %12, %14 : vector<8x128xf32>
      %c0_14 = arith.constant 0 : index
      %c0_15 = arith.constant 0 : index
      %16 = vector.load %arg6[%c0_14, %c0_15] : memref<8x128xf32, #tpu.memory_space<vmem>>, vector<8x128xf32>
      tpu.vector_store %arg6[%c0_14, %c0_15], %15 {strides = array<i32>} : memref<8x128xf32, #tpu.memory_space<vmem>>, vector<8x128xf32>,
    } else {
    }
    return
  }
  func.func @transform_0(%arg0: i32, %arg1: i32, %arg2: i32) -> (i32, i32) {
    %c0_i32 = arith.constant 0 : i32
    return %arg0, %arg2 : i32, i32
  }
  func.func @transform_1(%arg0: i32, %arg1: i32, %arg2: i32) -> (i32, i32) {
    %c0_i32 = arith.constant 0 : i32
    return %arg2, %arg1 : i32, i32
  }
  func.func @transform_2(%arg0: i32, %arg1: i32, %arg2: i32) -> (i32, i32) {
    %c0_i32 = arith.constant 0 : i32
    %c0_i32_0 = arith.constant 0 : i32
    return %c0_i32, %arg1 : i32, i32
  }
  func.func @transform_3(%arg0: i32, %arg1: i32, %arg2: i32) -> (i32, i32) {
    %c0_i32 = arith.constant 0 : i32
    return %arg0, %arg1 : i32, i32
  }
}

</mosaic_0001>

<bundles_post_ra>
// kernel: base_network_forward.5
= control target key start
LH: loop header
LB: loop body
LE: loop exit
PB: predicated region body
PF: predicated region fallthrough
CT: control target
= control target key end

     0   :  { %s2788_s1 = inlined_call_operand.vmem [shape: bf16[256,128], index: 1, kind: input, shape index: {}]   ;;  %s2789_s0 = inlined_call_operand.vmem [shape: bf16[4,128,256], index: 0, kind: input, shape index: {}]   ;;  %s2790_s2 = inlined_call_operand.vmem [shape: f32[1,128], index: 2, kind: input, shape index: {}]   ;;  %s2791_s3 = inlined_call_operand.vmem [shape: f32[1,128], index: 3, kind: input, shape index: {}]   ;;  %s2792_s4 = inlined_call_operand.vmem [shape: bf16[128,128], index: 4, kind: output, shape index: {}]  }
   0x1   :  { %v2054_v0 = vld [vmem:[%s2788_s1 + $0x78] sm:$0xff]   ;;  %v2056_v2 = vld [vmem:[%s2788_s1 + $0x70] sm:$0xff]   ;;  %v2206_v4 = vld [vmem:[%s2788_s1 + $0x68] sm:$0xff]  }
   0x2   :  { %v2055_v1 = vld [vmem:[%s2788_s1 + $0x38] sm:$0xff]   ;;  %1798 = vmatprep.subr.bf16.mxu0 %v2054_v0  ;;  %1862 = vmatprep.subr.bf16.mxu1 %v2054_v0  ;;  %v2057_v3 = vld [vmem:[%s2788_s1 + $0x30] sm:$0xff]   ;;  %v2211_v5 = vld [vmem:[%s2788_s1 + $0x28] sm:$0xff]  }
   0x3   :  { %1799 = vmatpush3.bf16.msra.mxu0 %v2055_v1  ;;  %1863 = vmatpush3.bf16.msra.mxu1 %v2055_v1  ;;  %v2218_v6 = vld [vmem:[%s2788_s1 + $0x60] sm:$0xff]   ;;  %v2232_v8 = vld [vmem:[%s2788_s1 + $0x58] sm:$0xff]   ;;  %v2246_v10 = vld [vmem:[%s2788_s1 + $0x50] sm:$0xff]  }
   0x4   :  { %1800 = vmatprep.subr.bf16.mxu0 %v2056_v2  ;;  %1864 = vmatprep.subr.bf16.mxu1 %v2056_v2  ;;  %v2225_v7 = vld [vmem:[%s2788_s1 + $0x20] sm:$0xff]   ;;  %v2239_v9 = vld [vmem:[%s2788_s1 + $0x18] sm:$0xff]   ;;  %v2259_v13 = vld [vmem:[%s2788_s1 + $0x10] sm:$0xff]  }
   0x5   :  { %v2072_v11 = vld [vmem:[%s2789_s0 + $0x4] ss:$8 sps:$4 sm:$0xff]   ;;  %v2070_v18 = vld [vmem:[%s2789_s0] ss:$8 sps:$4 sm:$0xff]   ;;  %v2076_v20 = vld [vmem:[%s2789_s0 + $0x14] ss:$8 sps:$4 sm:$0xff]  }
   0x6   :  { %v2075_v12 = vld [vmem:[%s2789_s0 + $0x84] ss:$8 sps:$4 sm:$0xff]   ;;  %358 = vmatprep.mubr.bf16.mxu0 %v2072_v11  ;;  %v2073_v19 = vld [vmem:[%s2789_s0 + $0x80] ss:$8 sps:$4 sm:$0xff]   ;;  %v2078_v21 = vld [vmem:[%s2789_s0 + $0x94] ss:$8 sps:$4 sm:$0xff]  }
   0x7   :  { %1801 = vmatpush3.bf16.msra.mxu0 %v2057_v3  ;;  %1865 = vmatpush3.bf16.msra.mxu1 %v2057_v3  ;;  %v2266_v14 = vld [vmem:[%s2788_s1 + $0x48] sm:$0xff]   ;;  %v2280_v16 = vld [vmem:[%s2788_s1 + $0x40] sm:$0xff]   ;;  %v2080_v22 = vld [vmem:[%s2789_s0 + $0x10] ss:$8 sps:$4 sm:$0xff]  }
   0x8   :  { %1802 = vmatprep.subr.bf16.mxu0 %v2206_v4  ;;  %1866 = vmatprep.subr.bf16.mxu1 %v2206_v4  ;;  %v2273_v15 = vld [vmem:[%s2788_s1 + $0x8] sm:$0xff]   ;;  %v2287_v17 = vld [vmem:[%s2788_s1] sm:$0xff]   ;;  %v2081_v23 = vld [vmem:[%s2789_s0 + $0x90] ss:$8 sps:$4 sm:$0xff]  }
   0x9   :  { %601 = vmatprep.mubr.bf16.mxu1 %v2075_v12  ;;  %v2082_v24 = vld [vmem:[%s2789_s0 + $0x24] ss:$8 sps:$4 sm:$0xff]   ;;  %v2086_v26 = vld [vmem:[%s2789_s0 + $0x20] ss:$8 sps:$4 sm:$0xff]   ;;  %v2088_v28 = vld [vmem:[%s2789_s0 + $0x34] ss:$8 sps:$4 sm:$0xff]  }
   0xa   :  { %v2084_v25 = vld [vmem:[%s2789_s0 + $0xa4] ss:$8 sps:$4 sm:$0xff]   ;;  %v2087_v27 = vld [vmem:[%s2789_s0 + $0xa0] ss:$8 sps:$4 sm:$0xff]   ;;  %v2090_v29 = vld [vmem:[%s2789_s0 + $0xb4] ss:$8 sps:$4 sm:$0xff]  }
   0xb   :  { %1803 = vmatpush3.bf16.msra.mxu0 %v2211_v5  ;;  %1867 = vmatpush3.bf16.msra.mxu1 %v2211_v5  ;;  %v2092_v30 = vld [vmem:[%s2789_s0 + $0x30] ss:$8 sps:$4 sm:$0xff]   ;;  %v2094_v32 = vld [vmem:[%s2789_s0 + $0x44] ss:$8 sps:$4 sm:$0xff]   ;;  %v2098_v34 = vld [vmem:[%s2789_s0 + $0x40] ss:$8 sps:$4 sm:$0xff]  }
   0xc   :  { %1804 = vmatprep.subr.bf16.mxu0 %v2218_v6  ;;  %1868 = vmatprep.subr.bf16.mxu1 %v2218_v6  ;;  %v2093_v31 = vld [vmem:[%s2789_s0 + $0xb0] ss:$8 sps:$4 sm:$0xff]   ;;  %v2096_v33 = vld [vmem:[%s2789_s0 + $0xc4] ss:$8 sps:$4 sm:$0xff]   ;;  %v2099_v35 = vld [vmem:[%s2789_s0 + $0xc0] ss:$8 sps:$4 sm:$0xff]  }
   0xd   :  { %v2100_v36 = vld [vmem:[%s2789_s0 + $0x54] ss:$8 sps:$4 sm:$0xff]   ;;  %v2104_v38 = vld [vmem:[%s2789_s0 + $0x50] ss:$8 sps:$4 sm:$0xff]   ;;  %v2106_v40 = vld [vmem:[%s2789_s0 + $0x64] ss:$8 sps:$4 sm:$0xff]  }
   0xe   :  { %v2102_v37 = vld [vmem:[%s2789_s0 + $0xd4] ss:$8 sps:$4 sm:$0xff]   ;;  %v2105_v39 = vld [vmem:[%s2789_s0 + $0xd0] ss:$8 sps:$4 sm:$0xff]   ;;  %v2108_v41 = vld [vmem:[%s2789_s0 + $0xe4] ss:$8 sps:$4 sm:$0xff]  }
   0xf   :  { %1805 = vmatpush3.bf16.msra.mxu0 %v2225_v7  ;;  %1869 = vmatpush3.bf16.msra.mxu1 %v2225_v7  ;;  %v2110_v42 = vld [vmem:[%s2789_s0 + $0x60] ss:$8 sps:$4 sm:$0xff]   ;;  %v2112_v44 = vld [vmem:[%s2789_s0 + $0x74] ss:$8 sps:$4 sm:$0xff]   ;;  %v2116_v46 = vld [vmem:[%s2789_s0 + $0x70] ss:$8 sps:$4 sm:$0xff]  }
  0x10   :  { %1806 = vmatprep.subr.bf16.mxu0 %v2232_v8  ;;  %1870 = vmatprep.subr.bf16.mxu1 %v2232_v8  ;;  %v2111_v43 = vld [vmem:[%s2789_s0 + $0xe0] ss:$8 sps:$4 sm:$0xff]   ;;  %v2114_v45 = vld [vmem:[%s2789_s0 + $0xf4] ss:$8 sps:$4 sm:$0xff]   ;;  %v2117_v47 = vld [vmem:[%s2789_s0 + $0xf0] ss:$8 sps:$4 sm:$0xff]  }
  0x11   :  { %v2120_v48 = vld [vmem:[%s2789_s0 + $0x104] ss:$8 sps:$4 sm:$0xff]   ;;  %v2118_v50 = vld [vmem:[%s2789_s0 + $0x100] ss:$8 sps:$4 sm:$0xff]   ;;  %v2124_v52 = vld [vmem:[%s2789_s0 + $0x114] ss:$8 sps:$4 sm:$0xff]  }
  0x12   :  { %v2123_v49 = vld [vmem:[%s2789_s0 + $0x184] ss:$8 sps:$4 sm:$0xff]   ;;  %v2121_v51 = vld [vmem:[%s2789_s0 + $0x180] ss:$8 sps:$4 sm:$0xff]   ;;  %v2126_v53 = vld [vmem:[%s2789_s0 + $0x194] ss:$8 sps:$4 sm:$0xff]  }
  0x13   :  { %1807 = vmatpush3.bf16.msra.mxu0 %v2239_v9  ;;  %1871 = vmatpush3.bf16.msra.mxu1 %v2239_v9  ;;  %v2128_v54 = vld [vmem:[%s2789_s0 + $0x110] ss:$8 sps:$4 sm:$0xff]   ;;  %v2130_v56 = vld [vmem:[%s2789_s0 + $0x124] ss:$8 sps:$4 sm:$0xff]   ;;  %v2134_v58 = vld [vmem:[%s2789_s0 + $0x120] ss:$8 sps:$4 sm:$0xff]  }
  0x14   :  { %1808 = vmatprep.subr.bf16.mxu0 %v2246_v10  ;;  %1872 = vmatprep.subr.bf16.mxu1 %v2246_v10  ;;  %v2129_v55 = vld [vmem:[%s2789_s0 + $0x190] ss:$8 sps:$4 sm:$0xff]   ;;  %v2132_v57 = vld [vmem:[%s2789_s0 + $0x1a4] ss:$8 sps:$4 sm:$0xff]   ;;  %v2135_v59 = vld [vmem:[%s2789_s0 + $0x1a0] ss:$8 sps:$4 sm:$0xff]  }
  0x15   :  { %v2136_v60 = vld [vmem:[%s2789_s0 + $0x134] ss:$8 sps:$4 sm:$0xff]   ;;  %v2140_v62 = vld [vmem:[%s2789_s0 + $0x130] ss:$8 sps:$4 sm:$0xff]   ;;  %v2159_v11 = vld [vmem:[%s2789_s0 + $0x1e0] ss:$8 sps:$4 sm:$0xff]  }
  0x16   :  { %v2138_v61 = vld [vmem:[%s2789_s0 + $0x1b4] ss:$8 sps:$4 sm:$0xff]   ;;  %v2141_v63 = vld [vmem:[%s2789_s0 + $0x1b0] ss:$8 sps:$4 sm:$0xff]  }
  0x17   :  { %1809 = vmatpush3.bf16.msra.mxu0 %v2259_v13  ;;  %1873 = vmatpush3.bf16.msra.mxu1 %v2259_v13  ;;  %v2160_v12 = vld [vmem:[%s2789_s0 + $0x174] ss:$8 sps:$4 sm:$0xff]  }
  0x18   :  { %1810 = vmatprep.subr.bf16.mxu0 %v2266_v14  ;;  %1874 = vmatprep.subr.bf16.mxu1 %v2266_v14 }
  0x1b   :  { %1811 = vmatpush3.bf16.msra.mxu0 %v2273_v15  ;;  %1875 = vmatpush3.bf16.msra.mxu1 %v2273_v15 }
  0x1c   :  { %1812 = vmatprep.subr.bf16.mxu0 %v2280_v16  ;;  %1876 = vmatprep.subr.bf16.mxu1 %v2280_v16 }
  0x1f   :  { %1813 = vmatpush3.bf16.msra.mxu0 %v2287_v17  ;;  %1877 = vmatpush3.bf16.msra.mxu1 %v2287_v17 }
  0x20   :  { %1926 = vmatprep.subr.bf16.mxu0 %v2054_v0  ;;  %1990 = vmatprep.subr.bf16.mxu1 %v2054_v0  ;;  %v2142_v0 = vld [vmem:[%s2789_s0 + $0x144] ss:$8 sps:$4 sm:$0xff]  }
  0x22   :  { %359 = vmatmul.mubr.bf16.vlgmr.msra.gmra.mxu0 %v2070_v18  ;;  %602 = vmatmul.mubr.bf16.vlgmr.msra.gmra.mxu1 %v2073_v19  ;;  %v2506_v19 = vld [vmem:[%s2790_s2] ss:$0 sm:$0xff] }
  0x23   :  { %1927 = vmatpush3.bf16.msra.mxu0 %v2055_v1  ;;  %1991 = vmatpush3.bf16.msra.mxu1 %v2055_v1  ;;  %v2144_v1 = vld [vmem:[%s2789_s0 + $0x1c4] ss:$8 sps:$4 sm:$0xff]  }
  0x24   :  { %366 = vmatprep.mubr.bf16.mxu0 %v2076_v20  ;;  %609 = vmatprep.mubr.bf16.mxu1 %v2078_v21 }
  0x25   :  { %1928 = vmatprep.subr.bf16.mxu0 %v2056_v2  ;;  %1992 = vmatprep.subr.bf16.mxu1 %v2056_v2  ;;  %v2146_v2 = vld [vmem:[%s2789_s0 + $0x140] ss:$8 sps:$4 sm:$0xff]  }
  0x27   :  { %1929 = vmatpush3.bf16.msra.mxu0 %v2057_v3  ;;  %1993 = vmatpush3.bf16.msra.mxu1 %v2057_v3  ;;  %v2147_v3 = vld [vmem:[%s2789_s0 + $0x1c0] ss:$8 sps:$4 sm:$0xff]  }
  0x28   :  { %1930 = vmatprep.subr.bf16.mxu0 %v2206_v4  ;;  %1994 = vmatprep.subr.bf16.mxu1 %v2206_v4  ;;  %v2148_v4 = vld [vmem:[%s2789_s0 + $0x154] ss:$8 sps:$4 sm:$0xff]  }
  0x2a   :  { %367 = vmatmul.mubr.bf16.gmra.mxu0 %v2080_v22  ;;  %610 = vmatmul.mubr.bf16.gmra.mxu1 %v2081_v23  ;;  %v2511_v23 = vld [vmem:[%s2791_s3] ss:$0 sm:$0xff] }
  0x2b   :  { %374 = vmatprep.mubr.bf16.mxu0 %v2082_v24  ;;  %617 = vmatprep.mubr.bf16.mxu1 %v2084_v25 }
  0x2c   :  { %1931 = vmatpush3.bf16.msra.mxu0 %v2211_v5  ;;  %1995 = vmatpush3.bf16.msra.mxu1 %v2211_v5  ;;  %v2150_v5 = vld [vmem:[%s2789_s0 + $0x1d4] ss:$8 sps:$4 sm:$0xff]  }
  0x2d   :  { %1932 = vmatprep.subr.bf16.mxu0 %v2218_v6  ;;  %1996 = vmatprep.subr.bf16.mxu1 %v2218_v6  ;;  %v2152_v6 = vld [vmem:[%s2789_s0 + $0x150] ss:$8 sps:$4 sm:$0xff]  }
  0x30   :  { %1933 = vmatpush3.bf16.msra.mxu0 %v2225_v7  ;;  %1997 = vmatpush3.bf16.msra.mxu1 %v2225_v7  ;;  %v2153_v7 = vld [vmem:[%s2789_s0 + $0x1d0] ss:$8 sps:$4 sm:$0xff]  }
  0x31   :  { %1934 = vmatprep.subr.bf16.mxu0 %v2232_v8  ;;  %1998 = vmatprep.subr.bf16.mxu1 %v2232_v8  ;;  %v2154_v8 = vld [vmem:[%s2789_s0 + $0x164] ss:$8 sps:$4 sm:$0xff]  }
  0x32   :  { %375 = vmatmul.mubr.bf16.gmra.mxu0 %v2086_v26  ;;  %618 = vmatmul.mubr.bf16.gmra.mxu1 %v2087_v27 }
  0x33   :  { %382 = vmatprep.mubr.bf16.mxu0 %v2088_v28  ;;  %625 = vmatprep.mubr.bf16.mxu1 %v2090_v29 }
  0x34   :  { %1935 = vmatpush3.bf16.msra.mxu0 %v2239_v9  ;;  %1999 = vmatpush3.bf16.msra.mxu1 %v2239_v9  ;;  %v2156_v9 = vld [vmem:[%s2789_s0 + $0x1e4] ss:$8 sps:$4 sm:$0xff]  }
  0x35   :  { %1936 = vmatprep.subr.bf16.mxu0 %v2246_v10  ;;  %2000 = vmatprep.subr.bf16.mxu1 %v2246_v10  ;;  %v2158_v10 = vld [vmem:[%s2789_s0 + $0x160] ss:$8 sps:$4 sm:$0xff]  }
  0x38   :  { %1937 = vmatpush3.bf16.msra.mxu0 %v2259_v13  ;;  %2001 = vmatpush3.bf16.msra.mxu1 %v2259_v13  ;;  %v2162_v13 = vld [vmem:[%s2789_s0 + $0x1f4] ss:$8 sps:$4 sm:$0xff]  }
  0x39   :  { %1938 = vmatprep.subr.bf16.mxu0 %v2266_v14  ;;  %2002 = vmatprep.subr.bf16.mxu1 %v2266_v14  ;;  %v2164_v14 = vld [vmem:[%s2789_s0 + $0x170] ss:$8 sps:$4 sm:$0xff]  }
  0x3a   :  { %383 = vmatmul.mubr.bf16.gmra.mxu0 %v2092_v30  ;;  %626 = vmatmul.mubr.bf16.gmra.mxu1 %v2093_v31 }
  0x3b   :  { %390 = vmatprep.mubr.bf16.mxu0 %v2094_v32  ;;  %633 = vmatprep.mubr.bf16.mxu1 %v2096_v33 }
  0x3c   :  { %1939 = vmatpush3.bf16.msra.mxu0 %v2273_v15  ;;  %2003 = vmatpush3.bf16.msra.mxu1 %v2273_v15  ;;  %v2165_v15 = vld [vmem:[%s2789_s0 + $0x1f0] ss:$8 sps:$4 sm:$0xff]  }
  0x3d   :  { %1940 = vmatprep.subr.bf16.mxu0 %v2280_v16  ;;  %2004 = vmatprep.subr.bf16.mxu1 %v2280_v16 }
  0x40   :  { %1941 = vmatpush3.bf16.msra.mxu0 %v2287_v17  ;;  %2005 = vmatpush3.bf16.msra.mxu1 %v2287_v17 }
  0x42   :  { %391 = vmatmul.mubr.bf16.gmra.mxu0 %v2098_v34  ;;  %634 = vmatmul.mubr.bf16.gmra.mxu1 %v2099_v35 }
  0x43   :  { %398 = vmatprep.mubr.bf16.mxu0 %v2100_v36  ;;  %641 = vmatprep.mubr.bf16.mxu1 %v2102_v37 }
  0x4a   :  { %399 = vmatmul.mubr.bf16.gmra.mxu0 %v2104_v38  ;;  %642 = vmatmul.mubr.bf16.gmra.mxu1 %v2105_v39 }
  0x4b   :  { %406 = vmatprep.mubr.bf16.mxu0 %v2106_v40  ;;  %649 = vmatprep.mubr.bf16.mxu1 %v2108_v41 }
  0x52   :  { %407 = vmatmul.mubr.bf16.gmra.mxu0 %v2110_v42  ;;  %650 = vmatmul.mubr.bf16.gmra.mxu1 %v2111_v43 }
  0x53   :  { %414 = vmatprep.mubr.bf16.mxu0 %v2112_v44  ;;  %657 = vmatprep.mubr.bf16.mxu1 %v2114_v45 }
  0x5a   :  { %415 = vmatmul.mubr.bf16.gmra.mxu0 %v2116_v46  ;;  %658 = vmatmul.mubr.bf16.gmra.mxu1 %v2117_v47 }
  0x5b   :  { %844 = vmatprep.mubr.bf16.mxu0 %v2120_v48  ;;  %1087 = vmatprep.mubr.bf16.mxu1 %v2123_v49 }
  0x62   :  { %845 = vmatmul.mubr.bf16.vlgmr.msra.gmra.mxu0 %v2118_v50  ;;  %1088 = vmatmul.mubr.bf16.vlgmr.msra.gmra.mxu1 %v2121_v51 }
  0x63   :  { %852 = vmatprep.mubr.bf16.mxu0 %v2124_v52  ;;  %1095 = vmatprep.mubr.bf16.mxu1 %v2126_v53 }
  0x6a   :  { %853 = vmatmul.mubr.bf16.gmra.mxu0 %v2128_v54  ;;  %1096 = vmatmul.mubr.bf16.gmra.mxu1 %v2129_v55 }
  0x6b   :  { %860 = vmatprep.mubr.bf16.mxu0 %v2130_v56  ;;  %1103 = vmatprep.mubr.bf16.mxu1 %v2132_v57 }
  0x72   :  { %861 = vmatmul.mubr.bf16.gmra.mxu0 %v2134_v58  ;;  %1104 = vmatmul.mubr.bf16.gmra.mxu1 %v2135_v59 }
  0x73   :  { %868 = vmatprep.mubr.bf16.mxu0 %v2136_v60  ;;  %1111 = vmatprep.mubr.bf16.mxu1 %v2138_v61 }
  0x7a   :  { %869 = vmatmul.mubr.bf16.gmra.mxu0 %v2140_v62  ;;  %1112 = vmatmul.mubr.bf16.gmra.mxu1 %v2141_v63 }
  0x7b   :  { %876 = vmatprep.mubr.bf16.mxu0 %v2142_v0  ;;  %1119 = vmatprep.mubr.bf16.mxu1 %v2144_v1 }
  0x82   :  { %877 = vmatmul.mubr.bf16.gmra.mxu0 %v2146_v2  ;;  %1120 = vmatmul.mubr.bf16.gmra.mxu1 %v2147_v3 }
  0x83   :  { %884 = vmatprep.mubr.bf16.mxu0 %v2148_v4  ;;  %1127 = vmatprep.mubr.bf16.mxu1 %v2150_v5 }
  0x8a   :  { %885 = vmatmul.mubr.bf16.gmra.mxu0 %v2152_v6  ;;  %1128 = vmatmul.mubr.bf16.gmra.mxu1 %v2153_v7 }
  0x8b   :  { %892 = vmatprep.mubr.bf16.mxu0 %v2154_v8  ;;  %1135 = vmatprep.mubr.bf16.mxu1 %v2156_v9 }
  0x92   :  { %893 = vmatmul.mubr.bf16.gmra.mxu0 %v2158_v10  ;;  %1136 = vmatmul.mubr.bf16.gmra.mxu1 %v2159_v11 }
  0x93   :  { %900 = vmatprep.mubr.bf16.mxu0 %v2160_v12  ;;  %1143 = vmatprep.mubr.bf16.mxu1 %v2162_v13 }
  0x9a   :  { %901 = vmatmul.mubr.bf16.gmra.mxu0 %v2164_v14  ;;  %1144 = vmatmul.mubr.bf16.gmra.mxu1 %v2165_v15 }
  0xe2   :  { %v1814_v16 = vpop.f32.mrf.mxu0  ;;  %v1878_v17 = vpop.f32.mrf.mxu1 }
  0xe4   :  { %v1815_v18 = vpop.f32.mrf.mxu0  ;;  %v1879_v20 = vpop.f32.mrf.mxu1 }
  0xe5   :  { %v1816_v21 = vadd.f32 %v1815_v18, %v1814_v16  ;;  %v1880_v22 = vadd.f32 %v1879_v20, %v1878_v17 }
  0xe6   :  { %v2513_v24 = vpop.f32.mrf.mxu0  ;;  %v2515_v25 = vpop.f32.mrf.mxu1 }
  0xe7   :  { %v1211_v26 = vmul.f32 %v1816_v21, %v2506_v19  ;;  %v1281_v27 = vmul.f32 %v1880_v22, %v2506_v19 }
  0xe8   :  { %v2519_v28 = vpop.f32.mrf.mxu0  ;;  %v2521_v29 = vpop.f32.mrf.mxu1 }
  0xe9   :  { %v1233_v30 = vadd.f32 %v2511_v23, %v1211_v26  ;;  %v1297_v31 = vadd.f32 %v2511_v23, %v1281_v27 }
  0xea   :  { %v1820_v32 = vpop.f32.mrf.mxu0  ;;  %v1884_v33 = vpop.f32.mrf.mxu1 }
  0xeb   :  { %v1249_v34 = vmax.f32 %v1233_v30, 0.0  ;;  %v1313_v35 = vmax.f32 %v1297_v31, 0.0 }
  0xec   :  { %v1821_v36 = vpop.f32.mrf.mxu0  ;;  %v1885_v37 = vpop.f32.mrf.mxu1 }
  0xed   :  { %v2525_v38 = vmax.f32 %v1249_v34, %v1313_v35  ;;  %v1822_v39 = vadd.f32 %v1821_v36, %v1820_v32  ;;  %v1886_v40 = vadd.f32 %v1885_v37, %v1884_v33 }
  0xee   :  { %v2527_v41 = vpop.f32.mrf.mxu0  ;;  %v2529_v42 = vpop.f32.mrf.mxu1 }
  0xef   :  { %v1213_v43 = vmul.f32 %v1822_v39, %v2506_v19  ;;  %v1283_v44 = vmul.f32 %v1886_v40, %v2506_v19 }
  0xf0   :  { %v2533_v45 = vpop.f32.mrf.mxu0  ;;  %v2535_v46 = vpop.f32.mrf.mxu1 }
  0xf1   :  { %v1235_v47 = vadd.f32 %v2511_v23, %v1213_v43  ;;  %v1299_v48 = vadd.f32 %v2511_v23, %v1283_v44 }
  0xf2   :  { %v1826_v49 = vpop.f32.mrf.mxu0  ;;  %v1890_v50 = vpop.f32.mrf.mxu1 }
  0xf3   :  { %v1251_v51 = vmax.f32 %v1235_v47, 0.0  ;;  %v1315_v52 = vmax.f32 %v1299_v48, 0.0 }
  0xf4   :  { %v1827_v53 = vpop.f32.mrf.mxu0  ;;  %v1891_v54 = vpop.f32.mrf.mxu1 }
  0xf5   :  { %v1828_v55 = vadd.f32 %v1827_v53, %v1826_v49  ;;  %v1892_v56 = vadd.f32 %v1891_v54, %v1890_v50  ;;  %v2539_v57 = vmax.f32 %v1251_v51, %v1315_v52 }
  0xf6   :  { %v2541_v58 = vpop.f32.mrf.mxu0  ;;  %v2543_v59 = vpop.f32.mrf.mxu1 }
  0xf7   :  { %v1215_v60 = vmul.f32 %v1828_v55, %v2506_v19  ;;  %v1285_v61 = vmul.f32 %v1892_v56, %v2506_v19 }
  0xf8   :  { %v2547_v62 = vpop.f32.mrf.mxu0  ;;  %v2549_v63 = vpop.f32.mrf.mxu1 }
  0xf9   :  { %v1237_v0 = vadd.f32 %v2511_v23, %v1215_v60  ;;  %v1301_v1 = vadd.f32 %v2511_v23, %v1285_v61 }
  0xfa   :  { %v1832_v2 = vpop.f32.mrf.mxu0  ;;  %v1896_v3 = vpop.f32.mrf.mxu1 }
  0xfb   :  { %v1253_v4 = vmax.f32 %v1237_v0, 0.0  ;;  %v1317_v5 = vmax.f32 %v1301_v1, 0.0 }
  0xfc   :  { %v1833_v6 = vpop.f32.mrf.mxu0  ;;  %v1897_v7 = vpop.f32.mrf.mxu1 }
  0xfd   :  { %v2553_v8 = vmax.f32 %v1253_v4, %v1317_v5  ;;  %v1834_v9 = vadd.f32 %v1833_v6, %v1832_v2  ;;  %v1898_v10 = vadd.f32 %v1897_v7, %v1896_v3 }
  0xfe   :  { %v2555_v11 = vpop.f32.mrf.mxu0  ;;  %v2557_v12 = vpop.f32.mrf.mxu1 }
  0xff   :  { %v1217_v13 = vmul.f32 %v1834_v9, %v2506_v19  ;;  %v1287_v14 = vmul.f32 %v1898_v10, %v2506_v19 }
 0x100   :  { %v2561_v15 = vpop.f32.mrf.mxu0  ;;  %v2563_v16 = vpop.f32.mrf.mxu1 }
 0x101   :  { %v1239_v17 = vadd.f32 %v2511_v23, %v1217_v13  ;;  %v1303_v18 = vadd.f32 %v2511_v23, %v1287_v14 }
 0x102   :  { %v1838_v20 = vpop.f32.mrf.mxu0  ;;  %v1902_v21 = vpop.f32.mrf.mxu1 }
 0x103   :  { %v1255_v22 = vmax.f32 %v1239_v17, 0.0  ;;  %v1319_v26 = vmax.f32 %v1303_v18, 0.0 }
 0x104   :  { %v1839_v27 = vpop.f32.mrf.mxu0  ;;  %v1903_v30 = vpop.f32.mrf.mxu1 }
 0x105   :  { %v2567_v31 = vmax.f32 %v1255_v22, %v1319_v26  ;;  %v1840_v32 = vadd.f32 %v1839_v27, %v1838_v20  ;;  %v1904_v33 = vadd.f32 %v1903_v30, %v1902_v21 }
 0x106   :  { %v2569_v34 = vpop.f32.mrf.mxu0  ;;  %v2571_v35 = vpop.f32.mrf.mxu1 }
 0x107   :  { %v1219_v36 = vmul.f32 %v1840_v32, %v2506_v19  ;;  %v1289_v37 = vmul.f32 %v1904_v33, %v2506_v19 }
 0x108   :  { %v2575_v39 = vpop.f32.mrf.mxu0  ;;  %v2577_v40 = vpop.f32.mrf.mxu1 }
 0x109   :  { %v1241_v43 = vadd.f32 %v2511_v23, %v1219_v36  ;;  %v1305_v44 = vadd.f32 %v2511_v23, %v1289_v37 }
 0x10a   :  { %v1844_v47 = vpop.f32.mrf.mxu0  ;;  %v1908_v48 = vpop.f32.mrf.mxu1 }
 0x10b   :  { %v1257_v49 = vmax.f32 %v1241_v43, 0.0  ;;  %v1321_v50 = vmax.f32 %v1305_v44, 0.0 }
 0x10c   :  { %v1845_v51 = vpop.f32.mrf.mxu0  ;;  %v1909_v52 = vpop.f32.mrf.mxu1 }
 0x10d   :  { %v1846_v53 = vadd.f32 %v1845_v51, %v1844_v47  ;;  %v1910_v54 = vadd.f32 %v1909_v52, %v1908_v48  ;;  %v2581_v55 = vmax.f32 %v1257_v49, %v1321_v50 }
 0x10e   :  { %v2583_v56 = vpop.f32.mrf.mxu0  ;;  %v2585_v60 = vpop.f32.mrf.mxu1 }
 0x10f   :  { %v1221_v61 = vmul.f32 %v1846_v53, %v2506_v19  ;;  %v1291_v0 = vmul.f32 %v1910_v54, %v2506_v19  ;;  %v1819_v54 = vadd.f32 %v2519_v28, %v2513_v24 }
 0x110   :  { %v2589_v1 = vpop.f32.mrf.mxu0  ;;  %v2591_v2 = vpop.f32.mrf.mxu1 }
 0x111   :  { %v1243_v3 = vadd.f32 %v2511_v23, %v1221_v61  ;;  %v1307_v4 = vadd.f32 %v2511_v23, %v1291_v0  ;;  %v1883_v61 = vadd.f32 %v2521_v29, %v2515_v25 }
 0x112   :  { %v1850_v5 = vpop.f32.mrf.mxu0  ;;  %v1914_v6 = vpop.f32.mrf.mxu1 }
 0x113   :  { %v1259_v7 = vmax.f32 %v1243_v3, 0.0  ;;  %v1323_v9 = vmax.f32 %v1307_v4, 0.0  ;;  %v1282_v24 = vmul.f32 %v1883_v61, %v2506_v19 }
 0x114   :  { %v1851_v10 = vpop.f32.mrf.mxu0  ;;  %v1915_v13 = vpop.f32.mrf.mxu1 }
 0x115   :  { %v2595_v14 = vmax.f32 %v1259_v7, %v1323_v9  ;;  %v1852_v17 = vadd.f32 %v1851_v10, %v1850_v5  ;;  %v1916_v18 = vadd.f32 %v1915_v13, %v1914_v6  ;;  %v1212_v13 = vmul.f32 %v1819_v54, %v2506_v19 }
 0x116   :  { %v2597_v20 = vpop.f32.mrf.mxu0  ;;  %v2599_v21 = vpop.f32.mrf.mxu1 }
 0x117   :  { %v1223_v22 = vmul.f32 %v1852_v17, %v2506_v19  ;;  %v1293_v26 = vmul.f32 %v1916_v18, %v2506_v19 }
 0x118   :  { %v2603_v27 = vpop.f32.mrf.mxu0  ;;  %v2605_v30 = vpop.f32.mrf.mxu1 }
 0x119   :  { %v1245_v32 = vadd.f32 %v2511_v23, %v1223_v22  ;;  %v1309_v33 = vadd.f32 %v2511_v23, %v1293_v26  ;;  %v1825_v26 = vadd.f32 %v2533_v45, %v2527_v41 }
 0x11a   :  { %v1856_v36 = vpop.f32.mrf.mxu0  ;;  %v1920_v37 = vpop.f32.mrf.mxu1 }
 0x11b   :  { %v1261_v43 = vmax.f32 %v1245_v32, 0.0  ;;  %v1325_v44 = vmax.f32 %v1309_v33, 0.0  ;;  %v1889_v32 = vadd.f32 %v2535_v46, %v2529_v42  ;;  %v1214_v45 = vmul.f32 %v1825_v26, %v2506_v19 }
 0x11c   :  { %v1857_v47 = vpop.f32.mrf.mxu0  ;;  %v1921_v48 = vpop.f32.mrf.mxu1  ;;  %v1831_v46 = vadd.f32 %v2547_v62, %v2541_v58 }
 0x11d   :  { %v2609_v49 = vmax.f32 %v1261_v43, %v1325_v44  ;;  %v1858_v50 = vadd.f32 %v1857_v47, %v1856_v36  ;;  %v1922_v51 = vadd.f32 %v1921_v48, %v1920_v37  ;;  %v1234_v43 = vadd.f32 %v2511_v23, %v1212_v13 }
 0x11e   :  { %v2611_v52 = vpop.f32.mrf.mxu0  ;;  %v2613_v53 = vpop.f32.mrf.mxu1  ;;  %v1298_v44 = vadd.f32 %v2511_v23, %v1282_v24  ;;  %v1284_v42 = vmul.f32 %v1889_v32, %v2506_v19  ;;  %v1895_v13 = vadd.f32 %v2549_v63, %v2543_v59  ;;  %v1216_v26 = vmul.f32 %v1831_v46, %v2506_v19 }
 0x11f   :  { %v1225_v0 = vmul.f32 %v1858_v50, %v2506_v19  ;;  %v1295_v3 = vmul.f32 %v1922_v51, %v2506_v19 }
 0x120   :  { %v2621_v4 = vpop.f32.mrf.mxu0  ;;  %v2623_v5 = vpop.f32.mrf.mxu1 }
 0x121   :  { %v1247_v6 = vadd.f32 %v2511_v23, %v1225_v0  ;;  %v1311_v7 = vadd.f32 %v2511_v23, %v1295_v3 }
 0x122   :  { %v1942_v9 = vpop.f32.mrf.mxu0  ;;  %v2006_v10 = vpop.f32.mrf.mxu1 }
 0x123   :  { %v1263_v28 = vmax.f32 %v1247_v6, 0.0  ;;  %v1327_v25 = vmax.f32 %v1311_v7, 0.0  ;;  %v1250_v6 = vmax.f32 %v1234_v43, 0.0  ;;  %v1314_v7 = vmax.f32 %v1298_v44, 0.0 }
 0x124   :  { %v1943_v29 = vpop.f32.mrf.mxu0  ;;  %v2007_v17 = vpop.f32.mrf.mxu1 }
 0x125   :  { %v1944_v18 = vadd.f32 %v1943_v29, %v1942_v9  ;;  %v2008_v22 = vadd.f32 %v2007_v17, %v2006_v10  ;;  %v2633_v33 = vmax.f32 %v1263_v28, %v1327_v25  ;;  %v1330_v63 = vmax.f32 %v1250_v6, %v1314_v7 }
 0x126   :  { %v1945_v36 = vpop.f32.mrf.mxu0  ;;  %v2009_v37 = vpop.f32.mrf.mxu1 }
 0x127   :  { %v1361_v47 = vmul.f32 %v1944_v18, %v2506_v19  ;;  %v1441_v48 = vmul.f32 %v2008_v22, %v2506_v19  ;;  %v1236_v18 = vadd.f32 %v2511_v23, %v1214_v45  ;;  %v1300_v22 = vadd.f32 %v2511_v23, %v1284_v42 }
 0x128   :  { %v1946_v50 = vpop.f32.mrf.mxu0  ;;  %v2010_v51 = vpop.f32.mrf.mxu1 }
 0x129   :  { %v1377_v54 = vadd.f32 %v2511_v23, %v1361_v47  ;;  %v1947_v41 = vadd.f32 %v1946_v50, %v1945_v36  ;;  %v2011_v61 = vadd.f32 %v2010_v51, %v2009_v37  ;;  %v1457_v24 = vadd.f32 %v2511_v23, %v1441_v48 }
 0x12a   :  { %v1948_v0 = vpop.f32.mrf.mxu0  ;;  %v2012_v3 = vpop.f32.mrf.mxu1  ;;  %v1286_v47 = vmul.f32 %v1895_v13, %v2506_v19 }
 0x12b   :  { %v1393_v9 = vmax.f32 %v1377_v54, 0.0  ;;  %v1362_v10 = vmul.f32 %v1947_v41, %v2506_v19  ;;  %v1442_v28 = vmul.f32 %v2011_v61, %v2506_v19  ;;  %v1473_v48 = vmax.f32 %v1457_v24, 0.0 }
 0x12c   :  { %v1949_v25 = vpop.f32.mrf.mxu0  ;;  %v2013_v29 = vpop.f32.mrf.mxu1  ;;  %v1252_v61 = vmax.f32 %v1236_v18, 0.0 }
 0x12d   :  { %v1378_v17 = vadd.f32 %v2511_v23, %v1362_v10  ;;  %v1950_v58 = vadd.f32 %v1949_v25, %v1948_v0  ;;  %v2014_v62 = vadd.f32 %v2013_v29, %v2012_v3  ;;  %v1458_v32 = vadd.f32 %v2511_v23, %v1442_v28 }
 0x12e   :  { %v1951_v36 = vpop.f32.mrf.mxu0  ;;  %v2015_v59 = vpop.f32.mrf.mxu1  ;;  %v1409_v37 = vmax.f32 %v2525_v38, %v1393_v9  ;;  %v1316_v0 = vmax.f32 %v1300_v22, 0.0  ;;  %v2660_v3 = vadd.f32 %v2511_v23, %v1216_v26  ;;  %v1837_v28 = vadd.f32 %v2561_v15, %v2555_v11 }
 0x12f   :  { %v1394_v43 = vmax.f32 %v1378_v17, 0.0  ;;  %v1363_v44 = vmul.f32 %v1950_v58, %v2506_v19  ;;  %v1443_v50 = vmul.f32 %v2014_v62, %v2506_v19  ;;  %v1474_v45 = vmax.f32 %v1458_v32, 0.0 }
 0x130   :  { %v1952_v51 = vpop.f32.mrf.mxu0  ;;  %v2016_v54 = vpop.f32.mrf.mxu1  ;;  %v1489_v9 = vmax.f32 %v1409_v37, %v1473_v48  ;;  %v1302_v62 = vadd.f32 %v2511_v23, %v1286_v47  ;;  %v1901_v32 = vadd.f32 %v2563_v16, %v2557_v12  ;;  %v1332_v37 = vmax.f32 %v1252_v61, %v1316_v0 }
 0x131   :  { %v1410_v41 = vmax.f32 %v1330_v63, %v1394_v43  ;;  %v1379_v42 = vadd.f32 %v2511_v23, %v1363_v44  ;;  %v1953_v46 = vadd.f32 %v1952_v51, %v1951_v36  ;;  %v2017_v38 = vadd.f32 %v2016_v54, %v2015_v59 }
 0x132   :  { %v1954_v6 = vpop.f32.mrf.mxu0  ;;  %v2018_v7 = vpop.f32.mrf.mxu1  ;;  %v1459_v25 = vadd.f32 %v2511_v23, %v1443_v50  ;;  %v1254_v43 = vmax.f32 %v2660_v3, 0.0  ;;  %v1218_v48 = vmul.f32 %v1837_v28, %v2506_v19  ;;  %v1288_v61 = vmul.f32 %v1901_v32, %v2506_v19 }
 0x133   :  { %v1490_v10 = vmax.f32 %v1410_v41, %v1474_v45  ;;  %v1395_v13 = vmax.f32 %v1379_v42, 0.0  ;;  %v1364_v24 = vmul.f32 %v1953_v46, %v2506_v19  ;;  %v1444_v29 = vmul.f32 %v2017_v38, %v2506_v19 }
 0x134   :  { %v1955_v17 = vpop.f32.mrf.mxu0  ;;  %v2019_v58 = vpop.f32.mrf.mxu1  ;;  %v1475_v12 = vmax.f32 %v1459_v25, 0.0  ;;  %v1318_v46 = vmax.f32 %v1302_v62, 0.0  ;;  %v1843_v0 = vadd.f32 %v2575_v39, %v2569_v34  ;;  %v1304_v62 = vadd.f32 %v2511_v23, %v1288_v61 }
 0x135   :  { %v1754_v18 = vpack.c.bf16 %v1490_v10, %v1489_v9  ;;  %v1380_v22 = vadd.f32 %v2511_v23, %v1364_v24  ;;  %v1956_v26 = vadd.f32 %v1955_v17, %v1954_v6  ;;  %v1411_v36 = vmax.f32 %v2539_v57, %v1395_v13 }
 0x136   :  { %v1460_v59 = vadd.f32 %v2511_v23, %v1444_v29  ;;  %v2020_v11 = vadd.f32 %v2019_v58, %v2018_v7  ;;  %v1957_v15 = vpop.f32.mrf.mxu0  ;;  %v2021_v63 = vpop.f32.mrf.mxu1  ;;  %v1907_v24 = vadd.f32 %v2577_v40, %v2571_v35  ;;  %v1240_v17 = vadd.f32 %v2511_v23, %v1218_v48 }
 0x137   :  { %1755 = vst [vmem:[%s2792_s4] sm:$0xff] %v1754_v18   ;;  %v1396_v44 = vmax.f32 %v1380_v22, 0.0  ;;  %v1365_v47 = vmul.f32 %v1956_v26, %v2506_v19  ;;  %v1491_v3 = vmax.f32 %v1411_v36, %v1475_v12  ;;  %v1220_v18 = vmul.f32 %v1843_v0, %v2506_v19 }
 0x138   :  { %v1476_v16 = vmax.f32 %v1460_v59, 0.0  ;;  %v1445_v57 = vmul.f32 %v2020_v11, %v2506_v19  ;;  %v1958_v50 = vpop.f32.mrf.mxu0  ;;  %v2022_v51 = vpop.f32.mrf.mxu1  ;;  %v1334_v35 = vmax.f32 %v1254_v43, %v1318_v46  ;;  %v1290_v11 = vmul.f32 %v1907_v24, %v2506_v19 }
 0x139   :  { %v1412_v54 = vmax.f32 %v1332_v37, %v1396_v44  ;;  %v1381_v41 = vadd.f32 %v2511_v23, %v1365_v47  ;;  %v1959_v45 = vadd.f32 %v1958_v50, %v1957_v15  ;;  %v2023_v42 = vadd.f32 %v2022_v51, %v2021_v63 }
 0x13a   :  { %v1960_v38 = vpop.f32.mrf.mxu0  ;;  %v2024_v6 = vpop.f32.mrf.mxu1  ;;  %v1461_v28 = vadd.f32 %v2511_v23, %v1445_v57  ;;  %v1256_v57 = vmax.f32 %v1240_v17, 0.0  ;;  %v1320_v50 = vmax.f32 %v1304_v62, 0.0  ;;  %v1242_v51 = vadd.f32 %v2511_v23, %v1220_v18 }
 0x13b   :  { %v1492_v7 = vmax.f32 %v1412_v54, %v1476_v16  ;;  %v1397_v9 = vmax.f32 %v1381_v41, 0.0  ;;  %v1366_v10 = vmul.f32 %v1959_v45, %v2506_v19  ;;  %v1446_v13 = vmul.f32 %v2023_v42, %v2506_v19 }
 0x13c   :  { %v1961_v25 = vpop.f32.mrf.mxu0  ;;  %v2025_v29 = vpop.f32.mrf.mxu1  ;;  %v1477_v15 = vmax.f32 %v1461_v28, 0.0  ;;  %v1306_v0 = vadd.f32 %v2511_v23, %v1290_v11  ;;  %v1849_v28 = vadd.f32 %v2589_v1, %v2583_v56  ;;  %v1258_v62 = vmax.f32 %v1242_v51, 0.0 }
 0x13d   :  { %v1759_v58 = vpack.c.bf16 %v1492_v7, %v1491_v3  ;;  %v1382_v34 = vadd.f32 %v2511_v23, %v1366_v10  ;;  %v1462_v39 = vadd.f32 %v2511_v23, %v1446_v13  ;;  %v1962_v22 = vadd.f32 %v1961_v25, %v1960_v38 }
 0x13e   :  { %v2026_v26 = vadd.f32 %v2025_v29, %v2024_v6  ;;  %v1963_v32 = vpop.f32.mrf.mxu0  ;;  %v2027_v36 = vpop.f32.mrf.mxu1  ;;  %v1413_v40 = vmax.f32 %v2553_v8, %v1397_v9  ;;  %v1913_v25 = vadd.f32 %v2591_v2, %v2585_v60 }
 0x13f   :  { %1791 = vst [vmem:[%s2792_s4 + $0x8] sm:$0xff] %v1759_v58   ;;  %v1398_v59 = vmax.f32 %v1382_v34, 0.0  ;;  %v1367_v63 = vmul.f32 %v1962_v22, %v2506_v19  ;;  %v1478_v12 = vmax.f32 %v1462_v39, 0.0  ;;  %v1336_v39 = vmax.f32 %v1256_v57, %v1320_v50 }
 0x140   :  { %v1447_v37 = vmul.f32 %v2026_v26, %v2506_v19  ;;  %v1964_v44 = vpop.f32.mrf.mxu0  ;;  %v2028_v47 = vpop.f32.mrf.mxu1  ;;  %v1493_v45 = vmax.f32 %v1413_v40, %v1477_v15  ;;  %v1322_v26 = vmax.f32 %v1306_v0, 0.0  ;;  %v1292_v11 = vmul.f32 %v1913_v25, %v2506_v19 }
 0x141   :  { %v1414_v48 = vmax.f32 %v1334_v35, %v1398_v59  ;;  %v1965_v16 = vadd.f32 %v1964_v44, %v1963_v32  ;;  %v2029_v43 = vadd.f32 %v2028_v47, %v2027_v36  ;;  %v1383_v8 = vadd.f32 %v2511_v23, %v1367_v63 }
 0x142   :  { %v1966_v54 = vpop.f32.mrf.mxu0  ;;  %v2030_v41 = vpop.f32.mrf.mxu1  ;;  %v1463_v38 = vadd.f32 %v2511_v23, %v1447_v37  ;;  %v1222_v59 = vmul.f32 %v1849_v28, %v2506_v19  ;;  %v1855_v15 = vadd.f32 %v2603_v27, %v2597_v20  ;;  %v1338_v0 = vmax.f32 %v1258_v62, %v1322_v26 }
 0x143   :  { %v1494_v42 = vmax.f32 %v1414_v48, %v1478_v12  ;;  %v1368_v46 = vmul.f32 %v1965_v16, %v2506_v19  ;;  %v1448_v61 = vmul.f32 %v2029_v43, %v2506_v19  ;;  %v1399_v3 = vmax.f32 %v1383_v8, 0.0 }
 0x144   :  { %v1967_v6 = vpop.f32.mrf.mxu0  ;;  %v2031_v7 = vpop.f32.mrf.mxu1  ;;  %v1479_v32 = vmax.f32 %v1463_v38, 0.0  ;;  %v1919_v43 = vadd.f32 %v2605_v30, %v2599_v21  ;;  %v1244_v27 = vadd.f32 %v2511_v23, %v1222_v59  ;;  %v1224_v21 = vmul.f32 %v1855_v15, %v2506_v19 }
 0x145   :  { %v1764_v9 = vpack.c.bf16 %v1494_v42, %v1493_v45  ;;  %v1384_v10 = vadd.f32 %v2511_v23, %v1368_v46  ;;  %v1464_v13 = vadd.f32 %v2511_v23, %v1448_v61  ;;  %v1968_v24 = vadd.f32 %v1967_v6, %v1966_v54 }
 0x146   :  { %v1415_v29 = vmax.f32 %v2567_v31, %v1399_v3  ;;  %v2032_v17 = vadd.f32 %v2031_v7, %v2030_v41  ;;  %v1969_v58 = vpop.f32.mrf.mxu0  ;;  %v2033_v34 = vpop.f32.mrf.mxu1  ;;  %v1308_v41 = vadd.f32 %v2511_v23, %v1292_v11  ;;  %v1294_v38 = vmul.f32 %v1919_v43, %v2506_v19 }
 0x147   :  { %1792 = vst [vmem:[%s2792_s4 + $0x10] sm:$0xff] %v1764_v9   ;;  %v1400_v18 = vmax.f32 %v1384_v10, 0.0  ;;  %v1369_v22 = vmul.f32 %v1968_v24, %v2506_v19  ;;  %v1480_v56 = vmax.f32 %v1464_v13, 0.0  ;;  %v1861_v11 = vadd.f32 %v2621_v4, %v2611_v52 }
 0x148   :  { %v1449_v1 = vmul.f32 %v2032_v17, %v2506_v19  ;;  %v1970_v60 = vpop.f32.mrf.mxu0  ;;  %v2034_v2 = vpop.f32.mrf.mxu1  ;;  %v1495_v63 = vmax.f32 %v1415_v29, %v1479_v32  ;;  %v1260_v17 = vmax.f32 %v1244_v27, 0.0  ;;  %v1246_v32 = vadd.f32 %v2511_v23, %v1224_v21 }
 0x149   :  { %v1416_v31 = vmax.f32 %v1336_v39, %v1400_v18  ;;  %v1385_v36 = vadd.f32 %v2511_v23, %v1369_v22  ;;  %v1971_v35 = vadd.f32 %v1970_v60, %v1969_v58  ;;  %v2035_v40 = vadd.f32 %v2034_v2, %v2033_v34 }
 0x14a   :  { %v1972_v37 = vpop.f32.mrf.mxu0  ;;  %v2036_v44 = vpop.f32.mrf.mxu1  ;;  %v1465_v57 = vadd.f32 %v2511_v23, %v1449_v1  ;;  %v1324_v58 = vmax.f32 %v1308_v41, 0.0  ;;  %v1925_v15 = vadd.f32 %v2623_v5, %v2613_v53  ;;  %v1262_v43 = vmax.f32 %v1246_v32, 0.0 }
 0x14b   :  { %v1496_v47 = vmax.f32 %v1416_v31, %v1480_v56  ;;  %v1401_v48 = vmax.f32 %v1385_v36, 0.0  ;;  %v1370_v12 = vmul.f32 %v1971_v35, %v2506_v19  ;;  %v1450_v16 = vmul.f32 %v2035_v40, %v2506_v19 }
 0x14c   :  { %v1973_v50 = vpop.f32.mrf.mxu0  ;;  %v2037_v51 = vpop.f32.mrf.mxu1  ;;  %v1481_v6 = vmax.f32 %v1465_v57, 0.0  ;;  %v1310_v56 = vadd.f32 %v2511_v23, %v1294_v38  ;;  %v1296_v27 = vmul.f32 %v1925_v15, %v2506_v19 }
 0x14d   :  { %v1769_v8 = vpack.c.bf16 %v1496_v47, %v1495_v63  ;;  %v1386_v54 = vadd.f32 %v2511_v23, %v1370_v12  ;;  %v1466_v20 = vadd.f32 %v2511_v23, %v1450_v16  ;;  %v1974_v45 = vadd.f32 %v1973_v50, %v1972_v37 }
 0x14e   :  { %v2038_v42 = vadd.f32 %v2037_v51, %v2036_v44  ;;  %v1975_v46 = vpop.f32.mrf.mxu0  ;;  %v2039_v61 = vpop.f32.mrf.mxu1  ;;  %v1417_v30 = vmax.f32 %v2581_v55, %v1401_v48  ;;  %v1340_v48 = vmax.f32 %v1260_v17, %v1324_v58 }
 0x14f   :  { %1793 = vst [vmem:[%s2792_s4 + $0x18] sm:$0xff] %v1769_v8   ;;  %v1402_v3 = vmax.f32 %v1386_v54, 0.0  ;;  %v1371_v7 = vmul.f32 %v1974_v45, %v2506_v19  ;;  %v1482_v28 = vmax.f32 %v1466_v20, 0.0  ;;  %v1326_v54 = vmax.f32 %v1310_v56, 0.0 }
 0x150   :  { %v1451_v9 = vmul.f32 %v2038_v42, %v2506_v19  ;;  %v1976_v10 = vpop.f32.mrf.mxu0  ;;  %v2040_v13 = vpop.f32.mrf.mxu1  ;;  %v1497_v62 = vmax.f32 %v1417_v30, %v1481_v6  ;;  %v1226_v20 = vmul.f32 %v1861_v11, %v2506_v19 }
 0x151   :  { %v1418_v24 = vmax.f32 %v1338_v0, %v1402_v3  ;;  %v1977_v25 = vadd.f32 %v1976_v10, %v1975_v46  ;;  %v2041_v29 = vadd.f32 %v2040_v13, %v2039_v61  ;;  %v1387_v34 = vadd.f32 %v2511_v23, %v1371_v7 }
 0x152   :  { %v1978_v39 = vpop.f32.mrf.mxu0  ;;  %v2042_v55 = vpop.f32.mrf.mxu1  ;;  %v1467_v60 = vadd.f32 %v2511_v23, %v1451_v9  ;;  %v1248_v10 = vadd.f32 %v2511_v23, %v1226_v20  ;;  %v1312_v13 = vadd.f32 %v2511_v23, %v1296_v27  ;;  %v1342_v17 = vmax.f32 %v1262_v43, %v1326_v54 }
 0x153   :  { %v1498_v18 = vmax.f32 %v1418_v24, %v1482_v28  ;;  %v1372_v22 = vmul.f32 %v1977_v25, %v2506_v19  ;;  %v1452_v26 = vmul.f32 %v2041_v29, %v2506_v19  ;;  %v1403_v1 = vmax.f32 %v1387_v34, 0.0 }
 0x154   :  { %v1979_v2 = vpop.f32.mrf.mxu0  ;;  %v2043_v31 = vpop.f32.mrf.mxu1  ;;  %v1483_v57 = vmax.f32 %v1467_v60, 0.0  ;;  %v1264_v60 = vmax.f32 %v1248_v10, 0.0 }
 0x155   :  { %v1774_v36 = vpack.c.bf16 %v1498_v18, %v1497_v62  ;;  %v1388_v35 = vadd.f32 %v2511_v23, %v1372_v22  ;;  %v1468_v40 = vadd.f32 %v2511_v23, %v1452_v26  ;;  %v1980_v59 = vadd.f32 %v1979_v2, %v1978_v39 }
 0x156   :  { %v1419_v63 = vmax.f32 %v2595_v14, %v1403_v1  ;;  %v2044_v37 = vadd.f32 %v2043_v31, %v2042_v55  ;;  %v1981_v44 = vpop.f32.mrf.mxu0  ;;  %v2045_v47 = vpop.f32.mrf.mxu1  ;;  %v1328_v2 = vmax.f32 %v1312_v13, 0.0 }
 0x157   :  { %1794 = vst [vmem:[%s2792_s4 + $0x20] sm:$0xff] %v1774_v36   ;;  %v1404_v12 = vmax.f32 %v1388_v35, 0.0  ;;  %v1373_v16 = vmul.f32 %v1980_v59, %v2506_v19  ;;  %v1484_v50 = vmax.f32 %v1468_v40, 0.0 }
 0x158   :  { %v1453_v52 = vmul.f32 %v2044_v37, %v2506_v19  ;;  %v1982_v4 = vpop.f32.mrf.mxu0  ;;  %v2046_v53 = vpop.f32.mrf.mxu1  ;;  %v1499_v41 = vmax.f32 %v1419_v63, %v1483_v57 }
 0x159   :  { %v1420_v5 = vmax.f32 %v1340_v48, %v1404_v12  ;;  %v1389_v14 = vadd.f32 %v2511_v23, %v1373_v16  ;;  %v1983_v51 = vadd.f32 %v1982_v4, %v1981_v44  ;;  %v2047_v8 = vadd.f32 %v2046_v53, %v2045_v47 }
 0x15a   :  { %v1984_v45 = vpop.f32.mrf.mxu0  ;;  %v2048_v42 = vpop.f32.mrf.mxu1  ;;  %v1469_v30 = vadd.f32 %v2511_v23, %v1453_v52  ;;  %v1344_v44 = vmax.f32 %v1264_v60, %v1328_v2 }
 0x15b   :  { %v1500_v46 = vmax.f32 %v1420_v5, %v1484_v50  ;;  %v1405_v61 = vmax.f32 %v1389_v14, 0.0  ;;  %v1374_v0 = vmul.f32 %v1983_v51, %v2506_v19  ;;  %v1454_v21 = vmul.f32 %v2047_v8, %v2506_v19 }
 0x15c   :  { %v1985_v3 = vpop.f32.mrf.mxu0  ;;  %v2049_v38 = vpop.f32.mrf.mxu1  ;;  %v1485_v39 = vmax.f32 %v1469_v30, 0.0 }
 0x15d   :  { %v1779_v6 = vpack.c.bf16 %v1500_v46, %v1499_v41  ;;  %v1390_v7 = vadd.f32 %v2511_v23, %v1374_v0  ;;  %v1470_v9 = vadd.f32 %v2511_v23, %v1454_v21  ;;  %v1986_v24 = vadd.f32 %v1985_v3, %v1984_v45 }
 0x15e   :  { %v2050_v28 = vadd.f32 %v2049_v38, %v2048_v42  ;;  %v1987_v25 = vpop.f32.mrf.mxu0  ;;  %v2051_v29 = vpop.f32.mrf.mxu1  ;;  %v1421_v58 = vmax.f32 %v2609_v49, %v1405_v61 }
 0x15f   :  { %1795 = vst [vmem:[%s2792_s4 + $0x28] sm:$0xff] %v1779_v6   ;;  %v1406_v34 = vmax.f32 %v1390_v7, 0.0  ;;  %v1486_v55 = vmax.f32 %v1470_v9, 0.0  ;;  %v1375_v62 = vmul.f32 %v1986_v24, %v2506_v19 }
 0x160   :  { %v1988_v18 = vpop.f32.mrf.mxu0  ;;  %v2052_v22 = vpop.f32.mrf.mxu1  ;;  %v1455_v32 = vmul.f32 %v2050_v28, %v2506_v19  ;;  %v1501_v36 = vmax.f32 %v1421_v58, %v1485_v39 }
 0x161   :  { %v1422_v26 = vmax.f32 %v1342_v17, %v1406_v34  ;;  %v1989_v56 = vadd.f32 %v1988_v18, %v1987_v25  ;;  %v2053_v1 = vadd.f32 %v2052_v22, %v2051_v29  ;;  %v1391_v31 = vadd.f32 %v2511_v23, %v1375_v62 }
 0x162   :  { %v1471_v15 = vadd.f32 %v2511_v23, %v1455_v32 }
 0x163   :  { %v1502_v35 = vmax.f32 %v1422_v26, %v1486_v55  ;;  %v1376_v49 = vmul.f32 %v1989_v56, %v2506_v19  ;;  %v1456_v40 = vmul.f32 %v2053_v1, %v2506_v19  ;;  %v1407_v59 = vmax.f32 %v1391_v31, 0.0 }
 0x164   :  { %v1487_v12 = vmax.f32 %v1471_v15, 0.0 }
 0x165   :  { %v1784_v11 = vpack.c.bf16 %v1502_v35, %v1501_v36  ;;  %v1392_v63 = vadd.f32 %v2511_v23, %v1376_v49  ;;  %v1472_v37 = vadd.f32 %v2511_v23, %v1456_v40  ;;  %v1423_v47 = vmax.f32 %v2633_v33, %v1407_v59 }
 0x167   :  { %1796 = vst [vmem:[%s2792_s4 + $0x30] sm:$0xff] %v1784_v11   ;;  %v1408_v48 = vmax.f32 %v1392_v63, 0.0  ;;  %v1488_v43 = vmax.f32 %v1472_v37, 0.0  ;;  %v1503_v19 = vmax.f32 %v1423_v47, %v1487_v12 }
 0x169   :  { %v1424_v16 = vmax.f32 %v1344_v44, %v1408_v48 }
 0x16b   :  { %v1504_v57 = vmax.f32 %v1424_v16, %v1488_v43 }
 0x16d   :  { %v1789_v50 = vpack.c.bf16 %v1504_v57, %v1503_v19 }
 0x16f   :  { %1797 = vst [vmem:[%s2792_s4 + $0x38] sm:$0xff] %v1789_v50  }

// kernel: base_network_forward.6
= control target key start
LH: loop header
LB: loop body
LE: loop exit
PB: predicated region body
PF: predicated region fallthrough
CT: control target
= control target key end

     0   :  { %s803_s1 = inlined_call_operand.vmem [shape: bf16[128,128], index: 1, kind: input, shape index: {}]   ;;  %s804_s0 = inlined_call_operand.vmem [shape: bf16[4,32,128], index: 0, kind: input, shape index: {}]   ;;  %s805_s2 = inlined_call_operand.vmem [shape: f32[1,128], index: 2, kind: input, shape index: {}]   ;;  %s806_s3 = inlined_call_operand.vmem [shape: f32[1,128], index: 3, kind: input, shape index: {}]   ;;  %s807_s4 = inlined_call_operand.vmem [shape: bf16[32,128], index: 4, kind: output, shape index: {}]  }
   0x1   :  { %v702_v0 = vld [vmem:[%s803_s1 + $0x38] sm:$0xff]   ;;  %v703_v1 = vld [vmem:[%s803_s1 + $0x30] sm:$0xff]   ;;  %v704_v2 = vld [vmem:[%s803_s1 + $0x28] sm:$0xff]  }
   0x2   :  { %622 = vmatprep.subr.bf16.mxu0 %v702_v0  ;;  %642 = vmatprep.subr.bf16.mxu1 %v702_v0  ;;  %v705_v3 = vld [vmem:[%s803_s1 + $0x20] sm:$0xff]   ;;  %v711_v5 = vld [vmem:[%s804_s0 + $0x10] sm:$0xff]   ;;  %v706_v6 = vld [vmem:[%s803_s1 + $0x18] sm:$0xff]  }
   0x3   :  { %623 = vmatpush3.bf16.msra.mxu0 %v702_v0  ;;  %643 = vmatpush3.bf16.msra.mxu1 %v702_v0  ;;  %v710_v4 = vld [vmem:[%s804_s0] sm:$0xff]   ;;  %v707_v7 = vld [vmem:[%s803_s1 + $0x10] sm:$0xff]   ;;  %v708_v8 = vld [vmem:[%s803_s1 + $0x8] sm:$0xff]  }
   0x4   :  { %624 = vmatprep.subr.bf16.mxu0 %v703_v1  ;;  %644 = vmatprep.subr.bf16.mxu1 %v703_v1  ;;  %v709_v9 = vld [vmem:[%s803_s1] sm:$0xff]   ;;  %v712_v10 = vld [vmem:[%s804_s0 + $0x8] sm:$0xff]   ;;  %v713_v11 = vld [vmem:[%s804_s0 + $0x18] sm:$0xff]  }
   0x5   :  { %638 = vmatprep.mubr.bf16.mxu0 %v710_v4  ;;  %658 = vmatprep.mubr.bf16.mxu1 %v711_v5  ;;  %v714_v12 = vld [vmem:[%s804_s0 + $0x20] sm:$0xff]   ;;  %v715_v13 = vld [vmem:[%s804_s0 + $0x30] sm:$0xff]   ;;  %v716_v14 = vld [vmem:[%s804_s0 + $0x28] sm:$0xff]  }
   0x6   :  { %v717_v15 = vld [vmem:[%s804_s0 + $0x38] sm:$0xff]   ;;  %v561_v22 = vld [vmem:[%s805_s2] ss:$0 sm:$0xff] }
   0x7   :  { %625 = vmatpush3.bf16.msra.mxu0 %v703_v1  ;;  %645 = vmatpush3.bf16.msra.mxu1 %v703_v1  ;;  %v562_v29 = vld [vmem:[%s806_s3] ss:$0 sm:$0xff] }
   0x8   :  { %626 = vmatprep.subr.bf16.mxu0 %v704_v2  ;;  %646 = vmatprep.subr.bf16.mxu1 %v704_v2 }
   0xb   :  { %627 = vmatpush3.bf16.msra.mxu0 %v704_v2  ;;  %647 = vmatpush3.bf16.msra.mxu1 %v704_v2 }
   0xc   :  { %628 = vmatprep.subr.bf16.mxu0 %v705_v3  ;;  %648 = vmatprep.subr.bf16.mxu1 %v705_v3 }
   0xf   :  { %629 = vmatpush3.bf16.msra.mxu0 %v705_v3  ;;  %649 = vmatpush3.bf16.msra.mxu1 %v705_v3 }
  0x10   :  { %630 = vmatprep.subr.bf16.mxu0 %v706_v6  ;;  %650 = vmatprep.subr.bf16.mxu1 %v706_v6 }
  0x13   :  { %631 = vmatpush3.bf16.msra.mxu0 %v706_v6  ;;  %651 = vmatpush3.bf16.msra.mxu1 %v706_v6 }
  0x14   :  { %632 = vmatprep.subr.bf16.mxu0 %v707_v7  ;;  %652 = vmatprep.subr.bf16.mxu1 %v707_v7 }
  0x17   :  { %633 = vmatpush3.bf16.msra.mxu0 %v707_v7  ;;  %653 = vmatpush3.bf16.msra.mxu1 %v707_v7 }
  0x18   :  { %634 = vmatprep.subr.bf16.mxu0 %v708_v8  ;;  %654 = vmatprep.subr.bf16.mxu1 %v708_v8 }
  0x1b   :  { %635 = vmatpush3.bf16.msra.mxu0 %v708_v8  ;;  %655 = vmatpush3.bf16.msra.mxu1 %v708_v8 }
  0x1c   :  { %636 = vmatprep.subr.bf16.mxu0 %v709_v9  ;;  %656 = vmatprep.subr.bf16.mxu1 %v709_v9 }
  0x1f   :  { %637 = vmatpush3.bf16.msra.mxu0 %v709_v9  ;;  %657 = vmatpush3.bf16.msra.mxu1 %v709_v9 }
  0x20   :  { %662 = vmatprep.subr.bf16.mxu0 %v702_v0  ;;  %682 = vmatprep.subr.bf16.mxu1 %v702_v0 }
  0x22   :  { %639 = vmatmul.mubr.bf16.vlgmr.msra.gmra.mxu0 %v712_v10  ;;  %659 = vmatmul.mubr.bf16.vlgmr.msra.gmra.mxu1 %v713_v11 }
  0x23   :  { %663 = vmatpush3.bf16.msra.mxu0 %v702_v0  ;;  %683 = vmatpush3.bf16.msra.mxu1 %v702_v0 }
  0x24   :  { %664 = vmatprep.subr.bf16.mxu0 %v703_v1  ;;  %684 = vmatprep.subr.bf16.mxu1 %v703_v1 }
  0x25   :  { %678 = vmatprep.mubr.bf16.mxu0 %v714_v12  ;;  %698 = vmatprep.mubr.bf16.mxu1 %v715_v13 }
  0x27   :  { %665 = vmatpush3.bf16.msra.mxu0 %v703_v1  ;;  %685 = vmatpush3.bf16.msra.mxu1 %v703_v1 }
  0x28   :  { %666 = vmatprep.subr.bf16.mxu0 %v704_v2  ;;  %686 = vmatprep.subr.bf16.mxu1 %v704_v2 }
  0x2b   :  { %667 = vmatpush3.bf16.msra.mxu0 %v704_v2  ;;  %687 = vmatpush3.bf16.msra.mxu1 %v704_v2 }
  0x2c   :  { %668 = vmatprep.subr.bf16.mxu0 %v705_v3  ;;  %688 = vmatprep.subr.bf16.mxu1 %v705_v3 }
  0x2f   :  { %669 = vmatpush3.bf16.msra.mxu0 %v705_v3  ;;  %689 = vmatpush3.bf16.msra.mxu1 %v705_v3 }
  0x30   :  { %670 = vmatprep.subr.bf16.mxu0 %v706_v6  ;;  %690 = vmatprep.subr.bf16.mxu1 %v706_v6 }
  0x33   :  { %671 = vmatpush3.bf16.msra.mxu0 %v706_v6  ;;  %691 = vmatpush3.bf16.msra.mxu1 %v706_v6 }
  0x34   :  { %672 = vmatprep.subr.bf16.mxu0 %v707_v7  ;;  %692 = vmatprep.subr.bf16.mxu1 %v707_v7 }
  0x37   :  { %673 = vmatpush3.bf16.msra.mxu0 %v707_v7  ;;  %693 = vmatpush3.bf16.msra.mxu1 %v707_v7 }
  0x38   :  { %674 = vmatprep.subr.bf16.mxu0 %v708_v8  ;;  %694 = vmatprep.subr.bf16.mxu1 %v708_v8 }
  0x3b   :  { %675 = vmatpush3.bf16.msra.mxu0 %v708_v8  ;;  %695 = vmatpush3.bf16.msra.mxu1 %v708_v8 }
  0x3c   :  { %676 = vmatprep.subr.bf16.mxu0 %v709_v9  ;;  %696 = vmatprep.subr.bf16.mxu1 %v709_v9 }
  0x3f   :  { %677 = vmatpush3.bf16.msra.mxu0 %v709_v9  ;;  %697 = vmatpush3.bf16.msra.mxu1 %v709_v9 }
  0x42   :  { %679 = vmatmul.mubr.bf16.vlgmr.msra.gmra.mxu0 %v716_v14  ;;  %699 = vmatmul.mubr.bf16.vlgmr.msra.gmra.mxu1 %v717_v15 }
  0xe2   :  { %v640_v16 = vpop.f32.mrf.mxu0  ;;  %v660_v17 = vpop.f32.mrf.mxu1 }
  0xe3   :  { %v433_v23 = vmul.f32 %v640_v16, %v561_v22  ;;  %v455_v24 = vmul.f32 %v660_v17, %v561_v22 }
  0xe4   :  { %v156_v18 = vpop.f32.mrf.mxu0  ;;  %v235_v19 = vpop.f32.mrf.mxu1 }
  0xe5   :  { %v431_v25 = vmul.f32 %v561_v22, %v156_v18  ;;  %v453_v26 = vmul.f32 %v561_v22, %v235_v19  ;;  %v443_v34 = vadd.f32 %v562_v29, %v433_v23  ;;  %v459_v35 = vadd.f32 %v562_v29, %v455_v24 }
  0xe6   :  { %v641_v20 = vpop.f32.mrf.mxu0  ;;  %v661_v21 = vpop.f32.mrf.mxu1 }
  0xe7   :  { %v434_v30 = vmul.f32 %v641_v20, %v561_v22  ;;  %v456_v31 = vmul.f32 %v661_v21, %v561_v22  ;;  %v441_v36 = vadd.f32 %v562_v29, %v431_v25  ;;  %v457_v37 = vadd.f32 %v562_v29, %v453_v26 }
  0xe8   :  { %v159_v27 = vpop.f32.mrf.mxu0  ;;  %v238_v28 = vpop.f32.mrf.mxu1  ;;  %v447_v50 = vmax.f32 %v443_v34, 0.0  ;;  %v463_v51 = vmax.f32 %v459_v35, 0.0 }
  0xe9   :  { %v432_v32 = vmul.f32 %v561_v22, %v159_v27  ;;  %v454_v33 = vmul.f32 %v561_v22, %v238_v28  ;;  %v444_v40 = vadd.f32 %v562_v29, %v434_v30  ;;  %v460_v41 = vadd.f32 %v562_v29, %v456_v31 }
  0xea   :  { %v445_v52 = vmax.f32 %v441_v36, 0.0  ;;  %v461_v53 = vmax.f32 %v457_v37, 0.0  ;;  %v467_v6 = vmax.f32 %v447_v50, %v463_v51 }
  0xeb   :  { %v442_v46 = vadd.f32 %v562_v29, %v432_v32  ;;  %v458_v47 = vadd.f32 %v562_v29, %v454_v33  ;;  %v448_v56 = vmax.f32 %v444_v40, 0.0  ;;  %v464_v57 = vmax.f32 %v460_v41, 0.0 }
  0xec   :  { %v465_v10 = vmax.f32 %v445_v52, %v461_v53 }
  0xed   :  { %v446_v2 = vmax.f32 %v442_v46, 0.0  ;;  %v462_v3 = vmax.f32 %v458_v47, 0.0  ;;  %v468_v11 = vmax.f32 %v448_v56, %v464_v57 }
  0xef   :  { %v466_v18 = vmax.f32 %v446_v2, %v462_v3 }
 0x102   :  { %v680_v38 = vpop.f32.mrf.mxu0  ;;  %v700_v39 = vpop.f32.mrf.mxu1 }
 0x103   :  { %v475_v42 = vmul.f32 %v680_v38, %v561_v22  ;;  %v495_v43 = vmul.f32 %v700_v39, %v561_v22 }
 0x104   :  { %v314_v44 = vpop.f32.mrf.mxu0  ;;  %v393_v45 = vpop.f32.mrf.mxu1 }
 0x105   :  { %v479_v48 = vadd.f32 %v562_v29, %v475_v42  ;;  %v473_v49 = vmul.f32 %v561_v22, %v314_v44  ;;  %v493_v59 = vmul.f32 %v561_v22, %v393_v45  ;;  %v499_v61 = vadd.f32 %v562_v29, %v495_v43 }
 0x106   :  { %v681_v54 = vpop.f32.mrf.mxu0  ;;  %v701_v55 = vpop.f32.mrf.mxu1 }
 0x107   :  { %v477_v58 = vadd.f32 %v562_v29, %v473_v49  ;;  %v483_v60 = vmax.f32 %v479_v48, 0.0  ;;  %v476_v62 = vmul.f32 %v681_v54, %v561_v22  ;;  %v496_v63 = vmul.f32 %v701_v55, %v561_v22 }
 0x108   :  { %v317_v0 = vpop.f32.mrf.mxu0  ;;  %v396_v1 = vpop.f32.mrf.mxu1  ;;  %v497_v12 = vadd.f32 %v562_v29, %v493_v59  ;;  %v503_v15 = vmax.f32 %v499_v61, 0.0 }
 0x109   :  { %v481_v4 = vmax.f32 %v477_v58, 0.0  ;;  %v474_v5 = vmul.f32 %v561_v22, %v317_v0  ;;  %v480_v7 = vadd.f32 %v562_v29, %v476_v62  ;;  %v500_v8 = vadd.f32 %v562_v29, %v496_v63 }
 0x10a   :  { %v494_v9 = vmul.f32 %v561_v22, %v396_v1  ;;  %v487_v14 = vmax.f32 %v467_v6, %v483_v60  ;;  %v501_v24 = vmax.f32 %v497_v12, 0.0 }
 0x10b   :  { %v478_v13 = vadd.f32 %v562_v29, %v474_v5  ;;  %v484_v16 = vmax.f32 %v480_v7, 0.0  ;;  %v485_v19 = vmax.f32 %v465_v10, %v481_v4  ;;  %v504_v23 = vmax.f32 %v500_v8, 0.0 }
 0x10c   :  { %v498_v17 = vadd.f32 %v562_v29, %v494_v9  ;;  %v507_v27 = vmax.f32 %v487_v14, %v503_v15 }
 0x10d   :  { %v482_v20 = vmax.f32 %v478_v13, 0.0  ;;  %v488_v21 = vmax.f32 %v468_v11, %v484_v16  ;;  %v505_v30 = vmax.f32 %v485_v19, %v501_v24 }
 0x10e   :  { %v502_v26 = vmax.f32 %v498_v17, 0.0 }
 0x10f   :  { %v486_v25 = vmax.f32 %v466_v18, %v482_v20  ;;  %v508_v28 = vmax.f32 %v488_v21, %v504_v23 }
 0x111   :  { %v506_v22 = vmax.f32 %v486_v25, %v502_v26  ;;  %v579_v31 = vpack.c.bf16 %v508_v28, %v507_v27 }
 0x113   :  { %v574_v32 = vpack.c.bf16 %v506_v22, %v505_v30  ;;  %581 = vst [vmem:[%s807_s4 + $0x8] sm:$0xff] %v579_v31  }
 0x115   :  { %575 = vst [vmem:[%s807_s4] sm:$0xff] %v574_v32  }

// kernel: base_network_forward.8
= control target key start
LH: loop header
LB: loop body
LE: loop exit
PB: predicated region body
PF: predicated region fallthrough
CT: control target
= control target key end

     0   :  { %v454_v1 = vmov 0   ;;  %v319_v34 = vlaneseq  ;;  %s583_s1 = inlined_call_operand.vmem [shape: bf16[128,512], index: 1, kind: input, shape index: {}]   ;;  %s584_s0 = inlined_call_operand.vmem [shape: bf16[8,128], index: 0, kind: input, shape index: {}]   ;;  %s585_s2 = inlined_call_operand.vmem [shape: f32[1,512], index: 2, kind: input, shape index: {}]   ;;  %s586_s3 = inlined_call_operand.vmem [shape: bf16[8,512], index: 3, kind: output, shape index: {}]  }
   0x1   :  { %v406_v0 = vld [vmem:[%s583_s1 + $0xe4] ss:$16 sps:$4 sm:$0xff]   ;;  %252 = vmatprep.mubr.bf16.mxu0 %v454_v1  ;;  %293 = vmatprep.mubr.bf16.mxu1 %v454_v1  ;;  %v408_v2 = vld [vmem:[%s583_s1 + $0xec] ss:$16 sps:$4 sm:$0xff]   ;;  %v410_v3 = vld [vmem:[%s583_s1 + $0xe0] ss:$16 sps:$4 sm:$0xff]  }
   0x2   :  { %220 = vmatprep.subr.bf16.mxu0 %v406_v0  ;;  %v411_v4 = vld [vmem:[%s583_s1 + $0xe8] ss:$16 sps:$4 sm:$0xff]   ;;  %261 = vmatprep.subr.bf16.mxu1 %v408_v2  ;;  %v412_v5 = vld [vmem:[%s583_s1 + $0xc4] ss:$16 sps:$4 sm:$0xff]   ;;  %v414_v6 = vld [vmem:[%s583_s1 + $0xcc] ss:$16 sps:$4 sm:$0xff]  }
   0x3   :  { %221 = vmatpush1.bf16.msra.mxu0 %v410_v3  ;;  %262 = vmatpush1.bf16.msra.mxu1 %v411_v4  ;;  %v416_v7 = vld [vmem:[%s583_s1 + $0xc0] ss:$16 sps:$4 sm:$0xff]   ;;  %v417_v8 = vld [vmem:[%s583_s1 + $0xc8] ss:$16 sps:$4 sm:$0xff]   ;;  %v418_v9 = vld [vmem:[%s583_s1 + $0xa4] ss:$16 sps:$4 sm:$0xff]  }
   0x4   :  { %222 = vmatprep.subr.bf16.mxu0 %v412_v5  ;;  %263 = vmatprep.subr.bf16.mxu1 %v414_v6  ;;  %v420_v10 = vld [vmem:[%s583_s1 + $0xac] ss:$16 sps:$4 sm:$0xff]   ;;  %v422_v11 = vld [vmem:[%s583_s1 + $0xa0] ss:$16 sps:$4 sm:$0xff]   ;;  %v423_v12 = vld [vmem:[%s583_s1 + $0xa8] ss:$16 sps:$4 sm:$0xff]  }
   0x5   :  { %v424_v13 = vld [vmem:[%s583_s1 + $0x84] ss:$16 sps:$4 sm:$0xff]   ;;  %v426_v14 = vld [vmem:[%s583_s1 + $0x8c] ss:$16 sps:$4 sm:$0xff]   ;;  %v428_v15 = vld [vmem:[%s583_s1 + $0x80] ss:$16 sps:$4 sm:$0xff]  }
   0x6   :  { %v429_v16 = vld [vmem:[%s583_s1 + $0x88] ss:$16 sps:$4 sm:$0xff]   ;;  %v430_v17 = vld [vmem:[%s583_s1 + $0x64] ss:$16 sps:$4 sm:$0xff]   ;;  %v432_v18 = vld [vmem:[%s583_s1 + $0x6c] ss:$16 sps:$4 sm:$0xff]  }
   0x7   :  { %223 = vmatpush1.bf16.msra.mxu0 %v416_v7  ;;  %264 = vmatpush1.bf16.msra.mxu1 %v417_v8  ;;  %v434_v19 = vld [vmem:[%s583_s1 + $0x60] ss:$16 sps:$4 sm:$0xff]   ;;  %v435_v20 = vld [vmem:[%s583_s1 + $0x68] ss:$16 sps:$4 sm:$0xff]   ;;  %v436_v21 = vld [vmem:[%s583_s1 + $0x44] ss:$16 sps:$4 sm:$0xff]  }
   0x8   :  { %224 = vmatprep.subr.bf16.mxu0 %v418_v9  ;;  %265 = vmatprep.subr.bf16.mxu1 %v420_v10  ;;  %v438_v22 = vld [vmem:[%s583_s1 + $0x4c] ss:$16 sps:$4 sm:$0xff]   ;;  %v440_v23 = vld [vmem:[%s583_s1 + $0x40] ss:$16 sps:$4 sm:$0xff]   ;;  %v441_v24 = vld [vmem:[%s583_s1 + $0x48] ss:$16 sps:$4 sm:$0xff]  }
   0x9   :  { %v442_v25 = vld [vmem:[%s583_s1 + $0x24] ss:$16 sps:$4 sm:$0xff]   ;;  %v444_v26 = vld [vmem:[%s583_s1 + $0x2c] ss:$16 sps:$4 sm:$0xff]   ;;  %v446_v27 = vld [vmem:[%s583_s1 + $0x20] ss:$16 sps:$4 sm:$0xff]  }
   0xa   :  { %v447_v28 = vld [vmem:[%s583_s1 + $0x28] ss:$16 sps:$4 sm:$0xff]   ;;  %v448_v29 = vld [vmem:[%s583_s1 + $0x4] ss:$16 sps:$4 sm:$0xff]   ;;  %v450_v30 = vld [vmem:[%s583_s1 + $0xc] ss:$16 sps:$4 sm:$0xff]  }
   0xb   :  { %225 = vmatpush1.bf16.msra.mxu0 %v422_v11  ;;  %266 = vmatpush1.bf16.msra.mxu1 %v423_v12  ;;  %v452_v31 = vld [vmem:[%s583_s1] ss:$16 sps:$4 sm:$0xff]   ;;  %v453_v32 = vld [vmem:[%s583_s1 + $0x8] ss:$16 sps:$4 sm:$0xff]   ;;  %v320_v35 = vshrl.u32 %v319_v34, 7 }
   0xc   :  { %226 = vmatprep.subr.bf16.mxu0 %v424_v13  ;;  %267 = vmatprep.subr.bf16.mxu1 %v426_v14  ;;  %v27_v33 = vld [vmem:[%s584_s0] sm:$0xf] }
   0xd   :  { %v321_v36 = vsub.s32 0, %v320_v35  ;;  %v329_v37 = vsub.s32 2, %v320_v35  ;;  %v317_v38 = vld [vmem:[%s585_s2] sm:$0xf]  ;;  %v325_v39 = vsub.s32 1, %v320_v35  ;;  %v333_v40 = vsub.s32 3, %v320_v35 }
   0xf   :  { %227 = vmatpush1.bf16.msra.mxu0 %v428_v15  ;;  %268 = vmatpush1.bf16.msra.mxu1 %v429_v16  ;;  %v322_v41 = vrot.slane %v317_v38, %v321_v36  ;;  %v330_v42 = vrot.slane %v317_v38, %v329_v37  ;;  %v326_v43 = vrot.slane %v317_v38, %v325_v39 }
  0x10   :  { %228 = vmatprep.subr.bf16.mxu0 %v430_v17  ;;  %269 = vmatprep.subr.bf16.mxu1 %v432_v18  ;;  %v334_v44 = vrot.slane %v317_v38, %v333_v40 }
  0x13   :  { %229 = vmatpush1.bf16.msra.mxu0 %v434_v19  ;;  %270 = vmatpush1.bf16.msra.mxu1 %v435_v20 }
  0x14   :  { %230 = vmatprep.subr.bf16.mxu0 %v436_v21  ;;  %271 = vmatprep.subr.bf16.mxu1 %v438_v22 }
  0x17   :  { %231 = vmatpush1.bf16.msra.mxu0 %v440_v23  ;;  %272 = vmatpush1.bf16.msra.mxu1 %v441_v24 }
  0x18   :  { %232 = vmatprep.subr.bf16.mxu0 %v442_v25  ;;  %273 = vmatprep.subr.bf16.mxu1 %v444_v26 }
  0x1b   :  { %233 = vmatpush1.bf16.msra.mxu0 %v446_v27  ;;  %274 = vmatpush1.bf16.msra.mxu1 %v447_v28 }
  0x1c   :  { %234 = vmatprep.subr.bf16.mxu0 %v448_v29  ;;  %275 = vmatprep.subr.bf16.mxu1 %v450_v30 }
  0x1f   :  { %235 = vmatpush1.bf16.msra.mxu0 %v452_v31  ;;  %276 = vmatpush1.bf16.msra.mxu1 %v453_v32 }
  0x22   :  { %253 = vmatmul.mubr.bf16.vlgmr.msra.gmra.mxu0 %v27_v33  ;;  %294 = vmatmul.mubr.bf16.vlgmr.msra.gmra.mxu1 %v27_v33 }
  0xe2   :  { %v254_v45 = vpop.f32.mrf.mxu0  ;;  %v295_v46 = vpop.f32.mrf.mxu1 }
  0xe3   :  { %v339_v47 = vadd.f32 %v322_v41, %v254_v45  ;;  %v341_v48 = vadd.f32 %v330_v42, %v295_v46 }
  0xe4   :  { %v256_v49 = vpop.f32.mrf.mxu0  ;;  %v297_v50 = vpop.f32.mrf.mxu1 }
  0xe5   :  { %v340_v51 = vadd.f32 %v326_v43, %v256_v49  ;;  %v342_v52 = vadd.f32 %v334_v44, %v297_v50  ;;  %v343_v55 = vmax.f32 %v339_v47, 0.0  ;;  %v345_v56 = vmax.f32 %v341_v48, 0.0 }
  0xe6   :  { %v258_v53 = vpop.f32.mrf.mxu0  ;;  %v299_v54 = vpop.f32.mrf.mxu1 }
  0xe7   :  { %v344_v57 = vmax.f32 %v340_v51, 0.0  ;;  %v346_v58 = vmax.f32 %v342_v52, 0.0 }
  0xe8   :  { %v259_v59 = vpop.f32.mrf.mxu0  ;;  %v300_v60 = vpop.f32.mrf.mxu1 }
  0xe9   :  { %v403_v61 = vpack.c.bf16 %v344_v57, %v343_v55  ;;  %v404_v62 = vpack.c.bf16 %v346_v58, %v345_v56 }
  0xeb   :  { %363 = vst [vmem:[%s586_s3] sm:$0xff] %v403_v61  ;;  %364 = vst [vmem:[%s586_s3 + $0x8] sm:$0xff] %v404_v62 }

// kernel: base_network_forward.7
= control target key start
LH: loop header
LB: loop body
LE: loop exit
PB: predicated region body
PF: predicated region fallthrough
CT: control target
= control target key end

     0   :  { %s665_s1 = inlined_call_operand.vmem [shape: bf16[256,128], index: 1, kind: input, shape index: {}]   ;;  %s666_s0 = inlined_call_operand.vmem [shape: bf16[4,8,256], index: 0, kind: input, shape index: {}]   ;;  %s667_s2 = inlined_call_operand.vmem [shape: f32[1,128], index: 2, kind: input, shape index: {}]   ;;  %s668_s3 = inlined_call_operand.vmem [shape: f32[1,128], index: 3, kind: input, shape index: {}]   ;;  %s669_s4 = inlined_call_operand.vmem [shape: bf16[8,128], index: 4, kind: output, shape index: {}]  }
   0x1   :  { %v523_v0 = vld [vmem:[%s665_s1 + $0x78] sm:$0xff]   ;;  %v583_v2 = vld [vmem:[%s665_s1 + $0x70] sm:$0xff]   ;;  %v597_v4 = vld [vmem:[%s665_s1 + $0x68] sm:$0xff]  }
   0x2   :  { %v578_v1 = vld [vmem:[%s665_s1 + $0x38] sm:$0xff]   ;;  %435 = vmatprep.subr.bf16.mxu0 %v523_v0  ;;  %457 = vmatprep.subr.bf16.mxu1 %v523_v0  ;;  %v590_v3 = vld [vmem:[%s665_s1 + $0x30] sm:$0xff]   ;;  %v528_v5 = vld [vmem:[%s665_s1 + $0x28] sm:$0xff]  }
   0x3   :  { %436 = vmatpush3.bf16.msra.mxu0 %v578_v1  ;;  %458 = vmatpush3.bf16.msra.mxu1 %v578_v1  ;;  %v529_v6 = vld [vmem:[%s665_s1 + $0x60] sm:$0xff]   ;;  %v531_v8 = vld [vmem:[%s665_s1 + $0x58] sm:$0xff]   ;;  %v533_v10 = vld [vmem:[%s665_s1 + $0x50] sm:$0xff]  }
   0x4   :  { %437 = vmatprep.subr.bf16.mxu0 %v583_v2  ;;  %459 = vmatprep.subr.bf16.mxu1 %v583_v2  ;;  %v530_v7 = vld [vmem:[%s665_s1 + $0x20] sm:$0xff]   ;;  %v532_v9 = vld [vmem:[%s665_s1 + $0x18] sm:$0xff]   ;;  %v424_v12 = vld [vmem:[%s666_s0 + $0x8] sm:$0xff] }
   0x5   :  { %v59_v11 = vld [vmem:[%s666_s0] sm:$0xff]  ;;  %v426_v14 = vcombine.high %v424_v12, %v424_v12  ;;  %v534_v15 = vld [vmem:[%s665_s1 + $0x10] sm:$0xff]   ;;  %v535_v16 = vld [vmem:[%s665_s1 + $0x48] sm:$0xff]   ;;  %v425_v21 = vcombine.low %v424_v12, %v424_v12 }
   0x6   :  { %v407_v13 = vcombine.high %v59_v11, %v59_v11  ;;  %v536_v17 = vld [vmem:[%s665_s1 + $0x8] sm:$0xff]   ;;  %v537_v18 = vld [vmem:[%s665_s1 + $0x40] sm:$0xff]   ;;  %v406_v20 = vcombine.low %v59_v11, %v59_v11  ;;  %v427_v22 = vld [vmem:[%s666_s0 + $0x10] sm:$0xff] }
   0x7   :  { %438 = vmatpush3.bf16.msra.mxu0 %v590_v3  ;;  %460 = vmatpush3.bf16.msra.mxu1 %v590_v3  ;;  %v538_v19 = vld [vmem:[%s665_s1] sm:$0xff]   ;;  %v430_v23 = vld [vmem:[%s666_s0 + $0x18] sm:$0xff]  ;;  %v429_v24 = vcombine.high %v427_v22, %v427_v22  ;;  %v428_v26 = vcombine.low %v427_v22, %v427_v22 }
   0x8   :  { %439 = vmatprep.subr.bf16.mxu0 %v597_v4  ;;  %461 = vmatprep.subr.bf16.mxu1 %v597_v4  ;;  %v432_v25 = vcombine.high %v430_v23, %v430_v23  ;;  %v431_v27 = vcombine.low %v430_v23, %v430_v23  ;;  %v433_v38 = vld [vmem:[%s667_s2] ss:$0 sm:$0xff] }
   0x9   :  { %195 = vmatprep.mubr.bf16.mxu0 %v407_v13  ;;  %248 = vmatprep.mubr.bf16.mxu1 %v426_v14  ;;  %v434_v41 = vld [vmem:[%s668_s3] ss:$0 sm:$0xff] }
   0xb   :  { %440 = vmatpush3.bf16.msra.mxu0 %v528_v5  ;;  %462 = vmatpush3.bf16.msra.mxu1 %v528_v5 }
   0xc   :  { %441 = vmatprep.subr.bf16.mxu0 %v529_v6  ;;  %463 = vmatprep.subr.bf16.mxu1 %v529_v6 }
   0xf   :  { %442 = vmatpush3.bf16.msra.mxu0 %v530_v7  ;;  %464 = vmatpush3.bf16.msra.mxu1 %v530_v7 }
  0x10   :  { %443 = vmatprep.subr.bf16.mxu0 %v531_v8  ;;  %465 = vmatprep.subr.bf16.mxu1 %v531_v8 }
  0x13   :  { %444 = vmatpush3.bf16.msra.mxu0 %v532_v9  ;;  %466 = vmatpush3.bf16.msra.mxu1 %v532_v9 }
  0x14   :  { %445 = vmatprep.subr.bf16.mxu0 %v533_v10  ;;  %467 = vmatprep.subr.bf16.mxu1 %v533_v10 }
  0x17   :  { %446 = vmatpush3.bf16.msra.mxu0 %v534_v15  ;;  %468 = vmatpush3.bf16.msra.mxu1 %v534_v15 }
  0x18   :  { %447 = vmatprep.subr.bf16.mxu0 %v535_v16  ;;  %469 = vmatprep.subr.bf16.mxu1 %v535_v16 }
  0x1b   :  { %448 = vmatpush3.bf16.msra.mxu0 %v536_v17  ;;  %470 = vmatpush3.bf16.msra.mxu1 %v536_v17 }
  0x1c   :  { %449 = vmatprep.subr.bf16.mxu0 %v537_v18  ;;  %471 = vmatprep.subr.bf16.mxu1 %v537_v18 }
  0x1f   :  { %450 = vmatpush3.bf16.msra.mxu0 %v538_v19  ;;  %472 = vmatpush3.bf16.msra.mxu1 %v538_v19 }
  0x20   :  { %479 = vmatprep.subr.bf16.mxu0 %v523_v0  ;;  %501 = vmatprep.subr.bf16.mxu1 %v523_v0 }
  0x22   :  { %196 = vmatmul.mubr.bf16.vlgmr.msra.gmra.mxu0 %v406_v20  ;;  %249 = vmatmul.mubr.bf16.vlgmr.msra.gmra.mxu1 %v425_v21 }
  0x23   :  { %480 = vmatpush3.bf16.msra.mxu0 %v578_v1  ;;  %502 = vmatpush3.bf16.msra.mxu1 %v578_v1 }
  0x24   :  { %481 = vmatprep.subr.bf16.mxu0 %v583_v2  ;;  %503 = vmatprep.subr.bf16.mxu1 %v583_v2 }
  0x25   :  { %301 = vmatprep.mubr.bf16.mxu0 %v429_v24  ;;  %354 = vmatprep.mubr.bf16.mxu1 %v432_v25 }
  0x27   :  { %482 = vmatpush3.bf16.msra.mxu0 %v590_v3  ;;  %504 = vmatpush3.bf16.msra.mxu1 %v590_v3 }
  0x28   :  { %483 = vmatprep.subr.bf16.mxu0 %v597_v4  ;;  %505 = vmatprep.subr.bf16.mxu1 %v597_v4 }
  0x2b   :  { %484 = vmatpush3.bf16.msra.mxu0 %v528_v5  ;;  %506 = vmatpush3.bf16.msra.mxu1 %v528_v5 }
  0x2c   :  { %485 = vmatprep.subr.bf16.mxu0 %v529_v6  ;;  %507 = vmatprep.subr.bf16.mxu1 %v529_v6 }
  0x2f   :  { %486 = vmatpush3.bf16.msra.mxu0 %v530_v7  ;;  %508 = vmatpush3.bf16.msra.mxu1 %v530_v7 }
  0x30   :  { %487 = vmatprep.subr.bf16.mxu0 %v531_v8  ;;  %509 = vmatprep.subr.bf16.mxu1 %v531_v8 }
  0x33   :  { %488 = vmatpush3.bf16.msra.mxu0 %v532_v9  ;;  %510 = vmatpush3.bf16.msra.mxu1 %v532_v9 }
  0x34   :  { %489 = vmatprep.subr.bf16.mxu0 %v533_v10  ;;  %511 = vmatprep.subr.bf16.mxu1 %v533_v10 }
  0x37   :  { %490 = vmatpush3.bf16.msra.mxu0 %v534_v15  ;;  %512 = vmatpush3.bf16.msra.mxu1 %v534_v15 }
  0x38   :  { %491 = vmatprep.subr.bf16.mxu0 %v535_v16  ;;  %513 = vmatprep.subr.bf16.mxu1 %v535_v16 }
  0x3b   :  { %492 = vmatpush3.bf16.msra.mxu0 %v536_v17  ;;  %514 = vmatpush3.bf16.msra.mxu1 %v536_v17 }
  0x3c   :  { %493 = vmatprep.subr.bf16.mxu0 %v537_v18  ;;  %515 = vmatprep.subr.bf16.mxu1 %v537_v18 }
  0x3f   :  { %494 = vmatpush3.bf16.msra.mxu0 %v538_v19  ;;  %516 = vmatpush3.bf16.msra.mxu1 %v538_v19 }
  0x42   :  { %302 = vmatmul.mubr.bf16.vlgmr.msra.gmra.mxu0 %v428_v26  ;;  %355 = vmatmul.mubr.bf16.vlgmr.msra.gmra.mxu1 %v431_v27 }
  0xe2   :  { %v451_v28 = vpop.f32.mrf.mxu0  ;;  %v473_v29 = vpop.f32.mrf.mxu1 }
  0xe4   :  { %v452_v30 = vpop.f32.mrf.mxu0  ;;  %v474_v31 = vpop.f32.mrf.mxu1 }
  0xe5   :  { %v453_v36 = vadd.f32 %v452_v30, %v451_v28  ;;  %v475_v37 = vadd.f32 %v474_v31, %v473_v29 }
  0xe6   :  { %v454_v32 = vpop.f32.mrf.mxu0  ;;  %v476_v33 = vpop.f32.mrf.mxu1 }
  0xe7   :  { %v376_v39 = vmul.f32 %v453_v36, %v433_v38  ;;  %v386_v40 = vmul.f32 %v475_v37, %v433_v38 }
  0xe8   :  { %v455_v34 = vpop.f32.mrf.mxu0  ;;  %v477_v35 = vpop.f32.mrf.mxu1 }
  0xe9   :  { %v383_v44 = vadd.f32 %v434_v41, %v376_v39  ;;  %v387_v45 = vadd.f32 %v434_v41, %v386_v40 }
  0xeb   :  { %v384_v52 = vmax.f32 %v383_v44, 0.0  ;;  %v388_v53 = vmax.f32 %v387_v45, 0.0 }
  0xed   :  { %v389_v60 = vmax.f32 %v384_v52, %v388_v53 }
 0x102   :  { %v495_v42 = vpop.f32.mrf.mxu0  ;;  %v517_v43 = vpop.f32.mrf.mxu1 }
 0x104   :  { %v496_v46 = vpop.f32.mrf.mxu0  ;;  %v518_v47 = vpop.f32.mrf.mxu1 }
 0x105   :  { %v497_v48 = vadd.f32 %v496_v46, %v495_v42  ;;  %v519_v49 = vadd.f32 %v518_v47, %v517_v43 }
 0x106   :  { %v498_v50 = vpop.f32.mrf.mxu0  ;;  %v520_v51 = vpop.f32.mrf.mxu1 }
 0x107   :  { %v391_v54 = vmul.f32 %v497_v48, %v433_v38  ;;  %v396_v55 = vmul.f32 %v519_v49, %v433_v38 }
 0x108   :  { %v499_v56 = vpop.f32.mrf.mxu0  ;;  %v521_v57 = vpop.f32.mrf.mxu1 }
 0x109   :  { %v392_v58 = vadd.f32 %v434_v41, %v391_v54  ;;  %v397_v59 = vadd.f32 %v434_v41, %v396_v55 }
 0x10b   :  { %v393_v61 = vmax.f32 %v392_v58, 0.0  ;;  %v398_v63 = vmax.f32 %v397_v59, 0.0 }
 0x10d   :  { %v394_v62 = vmax.f32 %v389_v60, %v393_v61 }
 0x10f   :  { %v399_v0 = vmax.f32 %v394_v62, %v398_v63 }
 0x111   :  { %v400_v1 = vpack.c.bf16 %v399_v0, %v399_v0 }
 0x113   :  { %401 = vst [vmem:[%s669_s4] sm:$0xf] %v400_v1 }

// kernel: base_network_forward.9
= control target key start
LH: loop header
LB: loop body
LE: loop exit
PB: predicated region body
PF: predicated region fallthrough
CT: control target
= control target key end

     0   :  { %s637_s1 = inlined_call_operand.vmem [shape: bf16[512,128], index: 1, kind: input, shape index: {}]   ;;  %s638_s0 = inlined_call_operand.vmem [shape: bf16[8,512], index: 0, kind: input, shape index: {}]   ;;  %s639_s2 = inlined_call_operand.vmem [shape: f32[1,128], index: 2, kind: input, shape index: {}]   ;;  %s640_s3 = inlined_call_operand.vmem [shape: f32[8,128], index: 3, kind: output, shape index: {}]  }
   0x1   :  { %v473_v0 = vld [vmem:[%s637_s1 + $0x78] sm:$0xff]   ;;  %v477_v4 = vld [vmem:[%s637_s1 + $0x70] sm:$0xff]   ;;  %v481_v8 = vld [vmem:[%s637_s1 + $0x68] sm:$0xff]  }
   0x2   :  { %v474_v1 = vld [vmem:[%s637_s1 + $0xf8] sm:$0xff]   ;;  %429 = vmatprep.subr.bf16.mxu0 %v473_v0  ;;  %v478_v5 = vld [vmem:[%s637_s1 + $0xf0] sm:$0xff]   ;;  %v482_v9 = vld [vmem:[%s637_s1 + $0xe8] sm:$0xff]  }
   0x3   :  { %v475_v2 = vld [vmem:[%s637_s1 + $0x38] sm:$0xff]   ;;  %451 = vmatprep.subr.bf16.mxu1 %v474_v1  ;;  %v479_v6 = vld [vmem:[%s637_s1 + $0x30] sm:$0xff]   ;;  %v483_v10 = vld [vmem:[%s637_s1 + $0x28] sm:$0xff]  }
   0x4   :  { %v476_v3 = vld [vmem:[%s637_s1 + $0xb8] sm:$0xff]   ;;  %430 = vmatpush3.bf16.msra.mxu0 %v475_v2  ;;  %v480_v7 = vld [vmem:[%s637_s1 + $0xb0] sm:$0xff]   ;;  %v484_v11 = vld [vmem:[%s637_s1 + $0xa8] sm:$0xff]  }
   0x5   :  { %452 = vmatpush3.bf16.msra.mxu1 %v476_v3  ;;  %431 = vmatprep.subr.bf16.mxu0 %v477_v4  ;;  %v485_v12 = vld [vmem:[%s637_s1 + $0x60] sm:$0xff]   ;;  %v489_v16 = vld [vmem:[%s637_s1 + $0x58] sm:$0xff]   ;;  %v493_v20 = vld [vmem:[%s637_s1 + $0x50] sm:$0xff]  }
   0x6   :  { %453 = vmatprep.subr.bf16.mxu1 %v478_v5  ;;  %v486_v13 = vld [vmem:[%s637_s1 + $0xe0] sm:$0xff]   ;;  %v490_v17 = vld [vmem:[%s637_s1 + $0xd8] sm:$0xff]   ;;  %v494_v21 = vld [vmem:[%s637_s1 + $0xd0] sm:$0xff]  }
   0x7   :  { %v487_v14 = vld [vmem:[%s637_s1 + $0x20] sm:$0xff]   ;;  %v491_v18 = vld [vmem:[%s637_s1 + $0x18] sm:$0xff]   ;;  %v495_v22 = vld [vmem:[%s637_s1 + $0x10] sm:$0xff]  }
   0x8   :  { %432 = vmatpush3.bf16.msra.mxu0 %v479_v6  ;;  %v488_v15 = vld [vmem:[%s637_s1 + $0xa0] sm:$0xff]   ;;  %v492_v19 = vld [vmem:[%s637_s1 + $0x98] sm:$0xff]   ;;  %v496_v23 = vld [vmem:[%s637_s1 + $0x90] sm:$0xff]  }
   0x9   :  { %454 = vmatpush3.bf16.msra.mxu1 %v480_v7  ;;  %433 = vmatprep.subr.bf16.mxu0 %v481_v8  ;;  %v497_v24 = vld [vmem:[%s637_s1 + $0x48] sm:$0xff]   ;;  %v501_v28 = vld [vmem:[%s637_s1 + $0x40] sm:$0xff]  }
   0xa   :  { %455 = vmatprep.subr.bf16.mxu1 %v482_v9  ;;  %v498_v25 = vld [vmem:[%s637_s1 + $0xc8] sm:$0xff]   ;;  %v502_v29 = vld [vmem:[%s637_s1 + $0xc0] sm:$0xff]  }
   0xb   :  { %v499_v26 = vld [vmem:[%s637_s1 + $0x8] sm:$0xff]   ;;  %v503_v30 = vld [vmem:[%s637_s1] sm:$0xff]  }
   0xc   :  { %434 = vmatpush3.bf16.msra.mxu0 %v483_v10  ;;  %v500_v27 = vld [vmem:[%s637_s1 + $0x88] sm:$0xff]   ;;  %v504_v31 = vld [vmem:[%s637_s1 + $0x80] sm:$0xff]  }
   0xd   :  { %456 = vmatpush3.bf16.msra.mxu1 %v484_v11  ;;  %435 = vmatprep.subr.bf16.mxu0 %v485_v12  ;;  %v21_v32 = vld [vmem:[%s638_s0] sm:$0xff]  ;;  %v22_v33 = vld [vmem:[%s638_s0 + $0x8] sm:$0xff] }
   0xe   :  { %457 = vmatprep.subr.bf16.mxu1 %v486_v13  ;;  %v392_v34 = vcombine.low %v21_v32, %v21_v32  ;;  %v393_v35 = vcombine.high %v21_v32, %v21_v32  ;;  %v394_v36 = vcombine.low %v22_v33, %v22_v33  ;;  %v395_v37 = vcombine.high %v22_v33, %v22_v33  ;;  %v428_v44 = vld [vmem:[%s639_s2] ss:$0 sm:$0xff] }
  0x10   :  { %436 = vmatpush3.bf16.msra.mxu0 %v487_v14  ;;  %325 = vmatprep.mubr.bf16.mxu0 %v393_v35 }
  0x11   :  { %458 = vmatpush3.bf16.msra.mxu1 %v488_v15  ;;  %437 = vmatprep.subr.bf16.mxu0 %v489_v16 }
  0x12   :  { %459 = vmatprep.subr.bf16.mxu1 %v490_v17  ;;  %365 = vmatprep.mubr.bf16.mxu1 %v395_v37 }
  0x14   :  { %438 = vmatpush3.bf16.msra.mxu0 %v491_v18 }
  0x15   :  { %460 = vmatpush3.bf16.msra.mxu1 %v492_v19  ;;  %439 = vmatprep.subr.bf16.mxu0 %v493_v20 }
  0x16   :  { %461 = vmatprep.subr.bf16.mxu1 %v494_v21 }
  0x18   :  { %440 = vmatpush3.bf16.msra.mxu0 %v495_v22 }
  0x19   :  { %462 = vmatpush3.bf16.msra.mxu1 %v496_v23  ;;  %441 = vmatprep.subr.bf16.mxu0 %v497_v24 }
  0x1a   :  { %463 = vmatprep.subr.bf16.mxu1 %v498_v25 }
  0x1c   :  { %442 = vmatpush3.bf16.msra.mxu0 %v499_v26 }
  0x1d   :  { %464 = vmatpush3.bf16.msra.mxu1 %v500_v27  ;;  %443 = vmatprep.subr.bf16.mxu0 %v501_v28 }
  0x1e   :  { %465 = vmatprep.subr.bf16.mxu1 %v502_v29 }
  0x20   :  { %444 = vmatpush3.bf16.msra.mxu0 %v503_v30 }
  0x21   :  { %466 = vmatpush3.bf16.msra.mxu1 %v504_v31 }
  0x23   :  { %326 = vmatmul.mubr.bf16.vlgmr.msra.gmra.mxu0 %v392_v34 }
  0x24   :  { %366 = vmatmul.mubr.bf16.vlgmr.msra.gmra.mxu1 %v394_v36 }
  0xe3   :  { %v445_v38 = vpop.f32.mrf.mxu0 }
  0xe4   :  { %v467_v39 = vpop.f32.mrf.mxu1 }
  0xe5   :  { %v446_v40 = vpop.f32.mrf.mxu0 }
  0xe6   :  { %v468_v41 = vpop.f32.mrf.mxu1  ;;  %v447_v42 = vadd.f32 %v446_v40, %v445_v38 }
  0xe7   :  { %v469_v43 = vadd.f32 %v468_v41, %v467_v39  ;;  %v448_v45 = vpop.f32.mrf.mxu0 }
  0xe8   :  { %v470_v46 = vpop.f32.mrf.mxu1 }
  0xe9   :  { %v368_v47 = vadd.f32 %v469_v43, %v447_v42  ;;  %v449_v48 = vpop.f32.mrf.mxu0 }
  0xea   :  { %v471_v49 = vpop.f32.mrf.mxu1 }
  0xeb   :  { %v386_v50 = vadd.f32 %v428_v44, %v368_v47 }
  0xed   :  { %387 = vst [vmem:[%s640_s3] sm:$0xff] %v386_v50 }

</bundles_post_ra>
